<compile_context>
chip_gen: v6e
topology: v6e:2x2x1
jax: 0.10.0
libtpu: 0.0.40
codegen_flags: <defaults>
</compile_context>

<pallas_src>
import functools
import math

import jax
import jax.numpy as jnp
import numpy as np
from jax import lax
from jax.experimental import pallas as pl
from jax.experimental.pallas import tpu as pltpu


def qmeta_kernel(xT_ref, wf_ref, out_ref, h_ref, *,
                 n_agents, embed_dim, chunk, n_chunks):
    """One batch tile of TB = n_chunks*chunk lanes, transposed layout.

    xT_ref  : (Pp, TB)             [states ; agent_qs ; 1 ; 0-pad]^T
    wf_ref  : (M, Pp)              block-diagonal fused hyper-net weight:
                                     rows [0, AE)      -> wk  (row i*E+e)
                                     rows [AE, 2AE)    -> wq  (row i*E+e)
                                     rows [2AE, 3AE)   -> w_agentqs (row j*E+e)
                                     rows [3AE, 3AE+A) -> agent_qs passthrough
    out_ref : (n_chunks, chunk)    q_tot, lane-dense rows (leading dim squeezed)
    h_ref   : (n_chunks, M, chunk) VMEM scratch holding the fused matmul result
    """
    A, E = n_agents, embed_dim
    AE = A * E
    inv_d = 1.0 / math.sqrt(float(E))

    # ---- 1. hyper-nets + bias adds + agent-q passthrough: one MXU matmul per
    #         lane chunk (static lane slices; the MXU is otherwise idle, so the
    #         old VPU outer-product hyper-net work is free here).
    for cc in range(n_chunks):
        h_ref[cc] = jnp.dot(wf_ref[...],
                            xT_ref[:, cc * chunk:(cc + 1) * chunk],
                            preferred_element_type=jnp.float32)

    # ---- 2. VPU/XLU stage: one lane chunk per fori_loop iteration so the live
    #         vreg set stays ~40 vregs (no spills).
    def chunk_body(c, carry):
        # q packed into per-l (A, chunk) slabs: q_slabs[l] row j = q[b, l, j]
        q_slabs = []
        for l in range(A):
            hq_l = h_ref[c, pl.ds(AE + l * E, E), :]                 # (E, C)
            rows = []
            for j in range(A):
                waq_j = h_ref[c, pl.ds(2 * AE + j * E, E), :]        # (E, C)
                rows.append(jnp.sum(hq_l * waq_j, axis=0, keepdims=True))
            q_slabs.append(jnp.concatenate(rows, axis=0))            # (A, C)

        # per-i: k-row dots, attention row, softmax over j, colsum accumulation
        colsum = None                                                # (A, C)
        for i in range(A):
            hk_i = h_ref[c, pl.ds(i * E, E), :]                      # (E, C)
            a_i = None                                               # (A, C)
            for l in range(A):
                waq_l = h_ref[c, pl.ds(2 * AE + l * E, E), :]        # (E, C)
                k_il = jnp.sum(hk_i * waq_l, axis=0, keepdims=True)  # (1, C)
                t = k_il * q_slabs[l]                                # sublane bcast
                a_i = t if a_i is None else a_i + t
            a_i = a_i * inv_d
            m = jnp.max(a_i, axis=0, keepdims=True)                  # (1, C)
            e = jnp.exp(a_i - m)                                     # (A, C)
            s = jnp.sum(e, axis=0, keepdims=True)                    # (1, C)
            # EUP approx reciprocal + one cheap Newton step: ~f32 accuracy across
            # TPU generations at ~2% of this stage's cost.
            r = pl.reciprocal(s, approx=True)
            inv_s = r * (2.0 - s * r)
            alpha_i = e * inv_s                                      # (A, C)
            colsum = alpha_i if colsum is None else colsum + alpha_i

        # q_tot = sum_j agent_qs[:, j] * colsum[j, :]  -> lane-dense (1, C) row
        aq = h_ref[c, pl.ds(3 * AE, A), :]                           # (A, C)
        y = jnp.sum(aq * colsum, axis=0, keepdims=True)              # (1, C)
        out_ref[pl.ds(c, 1), :] = y
        return carry

    lax.fori_loop(0, n_chunks, chunk_body, 0)


def _round_up(x, m):
    return (x + m - 1) // m * m


def qmeta_pallas(agent_qs, states, params, *, n_agents, embed_dim, block_b=1024):
    """agent_qs: (bs, T, A), states: (bs, T, S) -> (bs, T, 1)."""
    Wk, bk, Wq, bq, Waq, baq = params
    bs = agent_qs.shape[0]
    A, E = n_agents, embed_dim
    AE = A * E
    S = Wk.shape[0]
    P = S + A + 1                       # states | agent_qs | ones (bias input)
    Pp = _round_up(P, 8)
    M = 3 * AE + 8                      # wk | wq | w_agentqs | aq passthrough (+pad)

    st2 = states.reshape(-1, S).astype(jnp.float32)
    aq2 = agent_qs.reshape(-1, A).astype(jnp.float32)
    B = st2.shape[0]

    # Batch tile: large (amortise per-grid-step pipeline overhead) but capped at
    # ~ceil(B/2) rounded to 128 so the "parallel" batch grid has >=2 steps when
    # possible (v7x shards this axis across its 2 TensorCores).
    TB = max(128, min(_round_up(block_b, 128), _round_up(pl.cdiv(B, 2), 128)))
    Bp = _round_up(B, TB)
    chunk = 256 if TB % 256 == 0 else 128
    n_chunks = TB // chunk
    n_blocks = Bp // TB
    assert n_chunks * chunk == TB

    # Single fused activation slab (Pp, Bp): [states ; agent_qs ; 1 ; 0]^T with
    # zero-padded batch lanes (padded lanes stay finite and are sliced off).
    x = jnp.concatenate([st2, aq2, jnp.ones((B, 1), jnp.float32)], axis=1)   # (B, P)
    xT = jnp.pad(x, ((0, Bp - B), (0, Pp - P))).T                            # (Pp, Bp)

    # Block-diagonal fused hyper-net weight (M, Pp):
    #   [ Wk^T   0            bk        ]
    #   [ Wq^T   0            bq        ]
    #   [ 0      Waq^T(perm)  baq(perm) ]
    #   [ 0      I_A          0         ]   <- agent_qs passthrough rows
    # agent-q rows permuted from output index e*A+j to j*E+e so each agent
    # column j of w_agentqs is a contiguous E-row slab in the kernel.
    waqT_perm = (Waq.reshape(A, E, A).transpose(0, 2, 1)
                 .reshape(A, AE).T.astype(jnp.float32))                      # (AE, A)
    baq_perm = baq.reshape(E, A).T.reshape(AE).astype(jnp.float32)           # (AE,)

    Wf = jnp.zeros((M, Pp), jnp.float32)
    Wf = Wf.at[0:AE, 0:S].set(Wk.T.astype(jnp.float32))
    Wf = Wf.at[AE:2 * AE, 0:S].set(Wq.T.astype(jnp.float32))
    Wf = Wf.at[2 * AE:3 * AE, S:S + A].set(waqT_perm)
    Wf = Wf.at[0:AE, S + A].set(bk.astype(jnp.float32))
    Wf = Wf.at[AE:2 * AE, S + A].set(bq.astype(jnp.float32))
    Wf = Wf.at[2 * AE:3 * AE, S + A].set(baq_perm)
    Wf = Wf.at[3 * AE:3 * AE + A, S:S + A].set(jnp.eye(A, dtype=jnp.float32))

    out = pl.pallas_call(
        functools.partial(qmeta_kernel, n_agents=A, embed_dim=E,
                          chunk=chunk, n_chunks=n_chunks),
        out_shape=jax.ShapeDtypeStruct((n_blocks, n_chunks, chunk), jnp.float32),
        grid_spec=pltpu.PrefetchScalarGridSpec(
            num_scalar_prefetch=0,
            grid=(n_blocks,),
            in_specs=[
                pl.BlockSpec((Pp, TB), lambda b: (0, b)),          # activations^T
                pl.BlockSpec((M, Pp), lambda b: (0, 0)),           # fused hyper-net
            ],
            out_specs=pl.BlockSpec((None, n_chunks, chunk), lambda b: (b, 0, 0)),
            scratch_shapes=[pltpu.VMEM((n_chunks, M, chunk), jnp.float32)],
        ),
        compiler_params=pltpu.CompilerParams(
            dimension_semantics=("parallel",),
        ),
    )(xT, Wf)

    return out.reshape(-1)[:B].reshape(bs, -1, 1)


def qmeta_reference(agent_qs, states, params, *, n_agents, embed_dim):
    """Pure-JAX replica of the PyTorch forward for validation."""
    Wk, bk, Wq, bq, Waq, baq = params
    bs = agent_qs.shape[0]
    state_dim = Wk.shape[0]
    d = embed_dim ** 0.5

    st = states.reshape(-1, state_dim)
    aq2 = agent_qs.reshape(-1, n_agents)
    aq = agent_qs.reshape(-1, 1, n_agents)
    wk = (st @ Wk + bk).reshape(-1, n_agents, embed_dim)
    wq = (st @ Wq + bq).reshape(-1, n_agents, embed_dim)
    waq = (aq2 @ Waq + baq).reshape(-1, embed_dim, n_agents)
    k = jnp.matmul(wk, waq)
    q = jnp.matmul(wq, waq)
    a = jnp.matmul(k, q) / d
    a = a - a.max(axis=-1, keepdims=True)
    alpha = jax.nn.softmax(a, axis=-1)
    alpha = alpha.sum(axis=-2, keepdims=True)
    y = (aq * alpha).sum(axis=-1, keepdims=True)
    return y.reshape(bs, -1, 1)


def init_params(key, state_dim, n_agents, embed_dim):
    """Deterministic xavier-uniform init matching the module's shapes.

    JAX convention: weight (in, out), y = x @ W + b."""
    ks = jax.random.split(key, 6)

    def xavier(k, fan_in, fan_out):
        bound = math.sqrt(6.0 / (fan_in + fan_out))
        return jax.random.uniform(k, (fan_in, fan_out), jnp.float32, -bound, bound)

    def bias(k, fan_in, fan_out):
        bound = 1.0 / math.sqrt(fan_in)
        return jax.random.uniform(k, (fan_out,), jnp.float32, -bound, bound)

    Wk = xavier(ks[0], state_dim, embed_dim * n_agents)
    bk = bias(ks[1], state_dim, embed_dim * n_agents)
    Wq = xavier(ks[2], state_dim, embed_dim * n_agents)
    bq = bias(ks[3], state_dim, embed_dim * n_agents)
    Waq = xavier(ks[4], n_agents, embed_dim * n_agents)
    baq = bias(ks[5], n_agents, embed_dim * n_agents)
    return (Wk, bk, Wq, bq, Waq, baq)


if __name__ == "__main__":
    # Config consistent with the module: args.n_agents=4, args.mixing_embed_dim=32,
    # args.state_shape=(4, 8) -> state_dim=32.
    n_agents, embed_dim, state_dim = 4, 32, 32

    key = jax.random.PRNGKey(0)
    k_aq, k_st, k_par = jax.random.split(key, 3)
    params = init_params(k_par, state_dim, n_agents, embed_dim)

    # (bs, T): small case, padded multi-block case, multi-chunk / multi-block case.
    for bs, T in [(2, 8), (4, 100), (3, 800)]:
        agent_qs = jax.random.normal(k_aq, (bs, T, n_agents), jnp.float32)
        states = jax.random.normal(k_st, (bs, T, state_dim), jnp.float32)

        out = qmeta_pallas(agent_qs, states, params,
                           n_agents=n_agents, embed_dim=embed_dim)
        out = jax.block_until_ready(out)

        ref = qmeta_reference(agent_qs, states, params,
                              n_agents=n_agents, embed_dim=embed_dim)
        np.testing.assert_allclose(np.asarray(out), np.asarray(ref),
                                   rtol=2e-4, atol=1e-4)
        assert out.shape == (bs, T, 1)
    print("KERNEL_OK")
</pallas_src>

<mosaic_0001>
module attributes {stable_mosaic.version = 11 : i64} {
  func.func @qmeta_kernel(%arg0: i32, %arg1: memref<40x128xf32, #tpu.memory_space<vmem>>, %arg2: memref<392x40xf32, #tpu.memory_space<vmem>>, %arg3: memref<1x1x128xf32, #tpu.memory_space<vmem>>, %arg4: memref<1x392x128xf32, #tpu.memory_space<vmem>>) attributes {dimension_semantics = [#tpu.dimension_semantics<parallel>], iteration_bounds = array<i64: 1>, scalar_prefetch = 0 : i64, scratch_operands = 1 : i64, tpu.core_type = #tpu.core_type<tc>, window_params = [{transform_indices = @transform_0, window_bounds = array<i64: 40, 128>}, {pipeline_mode = #tpu.pipeline_mode<synchronous>, transform_indices = @transform_1, window_bounds = array<i64: 392, 40>}, {transform_indices = @transform_2, window_bounds = array<i64: 1, 1, 128>}]} {
    %c0 = arith.constant 0 : index
    %c0_0 = arith.constant 0 : index
    %0 = vector.load %arg2[%c0, %c0_0] : memref<392x40xf32, #tpu.memory_space<vmem>>, vector<392x40xf32>
    %c0_1 = arith.constant 0 : index
    %c0_2 = arith.constant 0 : index
    %1 = vector.load %arg1[%c0_1, %c0_2] : memref<40x128xf32, #tpu.memory_space<vmem>>, vector<40x128xf32>
    %cst = arith.constant dense<0.000000e+00> : vector<392x128xf32>
    %2 = tpu.matmul %0, %1, %cst {dimension_numbers = #tpu.dot_dimension_numbers<[1], [0], [0], [1], [0, 0, 1, 1], [], []>} : vector<392x40xf32>, vector<40x128xf32>, vector<392x128xf32> -> vector<392x128xf32>
    %c0_3 = arith.constant 0 : index
    %c0_4 = arith.constant 0 : index
    %c0_5 = arith.constant 0 : index
    %3 = vector.load %arg4[%c0_3, %c0_4, %c0_5] : memref<1x392x128xf32, #tpu.memory_space<vmem>>, vector<1x392x128xf32>
    %4 = vector.shape_cast %3 : vector<1x392x128xf32> to vector<392x128xf32>
    %5 = vector.shape_cast %2 : vector<392x128xf32> to vector<1x392x128xf32>
    tpu.vector_store %arg4[%c0_3, %c0_4, %c0_5], %5 {strides = array<i32>} : memref<1x392x128xf32, #tpu.memory_space<vmem>>, vector<1x392x128xf32>,
    %c0_i32 = arith.constant 0 : i32
    %6 = arith.index_cast %c0_i32 : i32 to index
    %c128 = arith.constant 128 : index
    %c0_6 = arith.constant 0 : index
    %7 = vector.load %arg4[%6, %c128, %c0_6] : memref<1x392x128xf32, #tpu.memory_space<vmem>>, vector<1x32x128xf32>
    %8 = vector.shape_cast %7 : vector<1x32x128xf32> to vector<32x128xf32>
    %9 = arith.index_cast %c0_i32 : i32 to index
    %c256 = arith.constant 256 : index
    %c0_7 = arith.constant 0 : index
    %10 = vector.load %arg4[%9, %c256, %c0_7] : memref<1x392x128xf32, #tpu.memory_space<vmem>>, vector<1x32x128xf32>
    %11 = vector.shape_cast %10 : vector<1x32x128xf32> to vector<32x128xf32>
    %12 = arith.mulf %8, %11 : vector<32x128xf32>
    %cst_8 = arith.constant dense<0.000000e+00> : vector<128xf32>
    %13 = vector.multi_reduction <add>, %12, %cst_8 [0] : vector<32x128xf32> to vector<128xf32>
    %14 = vector.shape_cast %13 : vector<128xf32> to vector<1x128xf32>
    %15 = arith.index_cast %c0_i32 : i32 to index
    %c288 = arith.constant 288 : index
    %c0_9 = arith.constant 0 : index
    %16 = vector.load %arg4[%15, %c288, %c0_9] : memref<1x392x128xf32, #tpu.memory_space<vmem>>, vector<1x32x128xf32>
    %17 = vector.shape_cast %16 : vector<1x32x128xf32> to vector<32x128xf32>
    %18 = arith.mulf %8, %17 : vector<32x128xf32>
    %cst_10 = arith.constant dense<0.000000e+00> : vector<128xf32>
    %19 = vector.multi_reduction <add>, %18, %cst_10 [0] : vector<32x128xf32> to vector<128xf32>
    %20 = vector.shape_cast %19 : vector<128xf32> to vector<1x128xf32>
    %21 = arith.index_cast %c0_i32 : i32 to index
    %c320 = arith.constant 320 : index
    %c0_11 = arith.constant 0 : index
    %22 = vector.load %arg4[%21, %c320, %c0_11] : memref<1x392x128xf32, #tpu.memory_space<vmem>>, vector<1x32x128xf32>
    %23 = vector.shape_cast %22 : vector<1x32x128xf32> to vector<32x128xf32>
    %24 = arith.mulf %8, %23 : vector<32x128xf32>
    %cst_12 = arith.constant dense<0.000000e+00> : vector<128xf32>
    %25 = vector.multi_reduction <add>, %24, %cst_12 [0] : vector<32x128xf32> to vector<128xf32>
    %26 = vector.shape_cast %25 : vector<128xf32> to vector<1x128xf32>
    %27 = arith.index_cast %c0_i32 : i32 to index
    %c352 = arith.constant 352 : index
    %c0_13 = arith.constant 0 : index
    %28 = vector.load %arg4[%27, %c352, %c0_13] : memref<1x392x128xf32, #tpu.memory_space<vmem>>, vector<1x32x128xf32>
    %29 = vector.shape_cast %28 : vector<1x32x128xf32> to vector<32x128xf32>
    %30 = arith.mulf %8, %29 : vector<32x128xf32>
    %cst_14 = arith.constant dense<0.000000e+00> : vector<128xf32>
    %31 = vector.multi_reduction <add>, %30, %cst_14 [0] : vector<32x128xf32> to vector<128xf32>
    %32 = vector.shape_cast %31 : vector<128xf32> to vector<1x128xf32>
    %33 = tpu.concatenate %14, %20, %26, %32 in 0 : vector<1x128xf32>, vector<1x128xf32>, vector<1x128xf32>, vector<1x128xf32> -> vector<4x128xf32>
    %34 = arith.index_cast %c0_i32 : i32 to index
    %c160 = arith.constant 160 : index
    %c0_15 = arith.constant 0 : index
    %35 = vector.load %arg4[%34, %c160, %c0_15] : memref<1x392x128xf32, #tpu.memory_space<vmem>>, vector<1x32x128xf32>
    %36 = vector.shape_cast %35 : vector<1x32x128xf32> to vector<32x128xf32>
    %37 = arith.index_cast %c0_i32 : i32 to index
    %c256_16 = arith.constant 256 : index
    %c0_17 = arith.constant 0 : index
    %38 = vector.load %arg4[%37, %c256_16, %c0_17] : memref<1x392x128xf32, #tpu.memory_space<vmem>>, vector<1x32x128xf32>
    %39 = vector.shape_cast %38 : vector<1x32x128xf32> to vector<32x128xf32>
    %40 = arith.mulf %36, %39 : vector<32x128xf32>
    %cst_18 = arith.constant dense<0.000000e+00> : vector<128xf32>
    %41 = vector.multi_reduction <add>, %40, %cst_18 [0] : vector<32x128xf32> to vector<128xf32>
    %42 = vector.shape_cast %41 : vector<128xf32> to vector<1x128xf32>
    %43 = arith.index_cast %c0_i32 : i32 to index
    %c288_19 = arith.constant 288 : index
    %c0_20 = arith.constant 0 : index
    %44 = vector.load %arg4[%43, %c288_19, %c0_20] : memref<1x392x128xf32, #tpu.memory_space<vmem>>, vector<1x32x128xf32>
    %45 = vector.shape_cast %44 : vector<1x32x128xf32> to vector<32x128xf32>
    %46 = arith.mulf %36, %45 : vector<32x128xf32>
    %cst_21 = arith.constant dense<0.000000e+00> : vector<128xf32>
    %47 = vector.multi_reduction <add>, %46, %cst_21 [0] : vector<32x128xf32> to vector<128xf32>
    %48 = vector.shape_cast %47 : vector<128xf32> to vector<1x128xf32>
    %49 = arith.index_cast %c0_i32 : i32 to index
    %c320_22 = arith.constant 320 : index
    %c0_23 = arith.constant 0 : index
    %50 = vector.load %arg4[%49, %c320_22, %c0_23] : memref<1x392x128xf32, #tpu.memory_space<vmem>>, vector<1x32x128xf32>
    %51 = vector.shape_cast %50 : vector<1x32x128xf32> to vector<32x128xf32>
    %52 = arith.mulf %36, %51 : vector<32x128xf32>
    %cst_24 = arith.constant dense<0.000000e+00> : vector<128xf32>
    %53 = vector.multi_reduction <add>, %52, %cst_24 [0] : vector<32x128xf32> to vector<128xf32>
    %54 = vector.shape_cast %53 : vector<128xf32> to vector<1x128xf32>
    %55 = arith.index_cast %c0_i32 : i32 to index
    %c352_25 = arith.constant 352 : index
    %c0_26 = arith.constant 0 : index
    %56 = vector.load %arg4[%55, %c352_25, %c0_26] : memref<1x392x128xf32, #tpu.memory_space<vmem>>, vector<1x32x128xf32>
    %57 = vector.shape_cast %56 : vector<1x32x128xf32> to vector<32x128xf32>
    %58 = arith.mulf %36, %57 : vector<32x128xf32>
    %cst_27 = arith.constant dense<0.000000e+00> : vector<128xf32>
    %59 = vector.multi_reduction <add>, %58, %cst_27 [0] : vector<32x128xf32> to vector<128xf32>
    %60 = vector.shape_cast %59 : vector<128xf32> to vector<1x128xf32>
    %61 = tpu.concatenate %42, %48, %54, %60 in 0 : vector<1x128xf32>, vector<1x128xf32>, vector<1x128xf32>, vector<1x128xf32> -> vector<4x128xf32>
    %62 = arith.index_cast %c0_i32 : i32 to index
    %c192 = arith.constant 192 : index
    %c0_28 = arith.constant 0 : index
    %63 = vector.load %arg4[%62, %c192, %c0_28] : memref<1x392x128xf32, #tpu.memory_space<vmem>>, vector<1x32x128xf32>
    %64 = vector.shape_cast %63 : vector<1x32x128xf32> to vector<32x128xf32>
    %65 = arith.index_cast %c0_i32 : i32 to index
    %c256_29 = arith.constant 256 : index
    %c0_30 = arith.constant 0 : index
    %66 = vector.load %arg4[%65, %c256_29, %c0_30] : memref<1x392x128xf32, #tpu.memory_space<vmem>>, vector<1x32x128xf32>
    %67 = vector.shape_cast %66 : vector<1x32x128xf32> to vector<32x128xf32>
    %68 = arith.mulf %64, %67 : vector<32x128xf32>
    %cst_31 = arith.constant dense<0.000000e+00> : vector<128xf32>
    %69 = vector.multi_reduction <add>, %68, %cst_31 [0] : vector<32x128xf32> to vector<128xf32>
    %70 = vector.shape_cast %69 : vector<128xf32> to vector<1x128xf32>
    %71 = arith.index_cast %c0_i32 : i32 to index
    %c288_32 = arith.constant 288 : index
    %c0_33 = arith.constant 0 : index
    %72 = vector.load %arg4[%71, %c288_32, %c0_33] : memref<1x392x128xf32, #tpu.memory_space<vmem>>, vector<1x32x128xf32>
    %73 = vector.shape_cast %72 : vector<1x32x128xf32> to vector<32x128xf32>
    %74 = arith.mulf %64, %73 : vector<32x128xf32>
    %cst_34 = arith.constant dense<0.000000e+00> : vector<128xf32>
    %75 = vector.multi_reduction <add>, %74, %cst_34 [0] : vector<32x128xf32> to vector<128xf32>
    %76 = vector.shape_cast %75 : vector<128xf32> to vector<1x128xf32>
    %77 = arith.index_cast %c0_i32 : i32 to index
    %c320_35 = arith.constant 320 : index
    %c0_36 = arith.constant 0 : index
    %78 = vector.load %arg4[%77, %c320_35, %c0_36] : memref<1x392x128xf32, #tpu.memory_space<vmem>>, vector<1x32x128xf32>
    %79 = vector.shape_cast %78 : vector<1x32x128xf32> to vector<32x128xf32>
    %80 = arith.mulf %64, %79 : vector<32x128xf32>
    %cst_37 = arith.constant dense<0.000000e+00> : vector<128xf32>
    %81 = vector.multi_reduction <add>, %80, %cst_37 [0] : vector<32x128xf32> to vector<128xf32>
    %82 = vector.shape_cast %81 : vector<128xf32> to vector<1x128xf32>
    %83 = arith.index_cast %c0_i32 : i32 to index
    %c352_38 = arith.constant 352 : index
    %c0_39 = arith.constant 0 : index
    %84 = vector.load %arg4[%83, %c352_38, %c0_39] : memref<1x392x128xf32, #tpu.memory_space<vmem>>, vector<1x32x128xf32>
    %85 = vector.shape_cast %84 : vector<1x32x128xf32> to vector<32x128xf32>
    %86 = arith.mulf %64, %85 : vector<32x128xf32>
    %cst_40 = arith.constant dense<0.000000e+00> : vector<128xf32>
    %87 = vector.multi_reduction <add>, %86, %cst_40 [0] : vector<32x128xf32> to vector<128xf32>
    %88 = vector.shape_cast %87 : vector<128xf32> to vector<1x128xf32>
    %89 = tpu.concatenate %70, %76, %82, %88 in 0 : vector<1x128xf32>, vector<1x128xf32>, vector<1x128xf32>, vector<1x128xf32> -> vector<4x128xf32>
    %90 = arith.index_cast %c0_i32 : i32 to index
    %c224 = arith.constant 224 : index
    %c0_41 = arith.constant 0 : index
    %91 = vector.load %arg4[%90, %c224, %c0_41] : memref<1x392x128xf32, #tpu.memory_space<vmem>>, vector<1x32x128xf32>
    %92 = vector.shape_cast %91 : vector<1x32x128xf32> to vector<32x128xf32>
    %93 = arith.index_cast %c0_i32 : i32 to index
    %c256_42 = arith.constant 256 : index
    %c0_43 = arith.constant 0 : index
    %94 = vector.load %arg4[%93, %c256_42, %c0_43] : memref<1x392x128xf32, #tpu.memory_space<vmem>>, vector<1x32x128xf32>
    %95 = vector.shape_cast %94 : vector<1x32x128xf32> to vector<32x128xf32>
    %96 = arith.mulf %92, %95 : vector<32x128xf32>
    %cst_44 = arith.constant dense<0.000000e+00> : vector<128xf32>
    %97 = vector.multi_reduction <add>, %96, %cst_44 [0] : vector<32x128xf32> to vector<128xf32>
    %98 = vector.shape_cast %97 : vector<128xf32> to vector<1x128xf32>
    %99 = arith.index_cast %c0_i32 : i32 to index
    %c288_45 = arith.constant 288 : index
    %c0_46 = arith.constant 0 : index
    %100 = vector.load %arg4[%99, %c288_45, %c0_46] : memref<1x392x128xf32, #tpu.memory_space<vmem>>, vector<1x32x128xf32>
    %101 = vector.shape_cast %100 : vector<1x32x128xf32> to vector<32x128xf32>
    %102 = arith.mulf %92, %101 : vector<32x128xf32>
    %cst_47 = arith.constant dense<0.000000e+00> : vector<128xf32>
    %103 = vector.multi_reduction <add>, %102, %cst_47 [0] : vector<32x128xf32> to vector<128xf32>
    %104 = vector.shape_cast %103 : vector<128xf32> to vector<1x128xf32>
    %105 = arith.index_cast %c0_i32 : i32 to index
    %c320_48 = arith.constant 320 : index
    %c0_49 = arith.constant 0 : index
    %106 = vector.load %arg4[%105, %c320_48, %c0_49] : memref<1x392x128xf32, #tpu.memory_space<vmem>>, vector<1x32x128xf32>
    %107 = vector.shape_cast %106 : vector<1x32x128xf32> to vector<32x128xf32>
    %108 = arith.mulf %92, %107 : vector<32x128xf32>
    %cst_50 = arith.constant dense<0.000000e+00> : vector<128xf32>
    %109 = vector.multi_reduction <add>, %108, %cst_50 [0] : vector<32x128xf32> to vector<128xf32>
    %110 = vector.shape_cast %109 : vector<128xf32> to vector<1x128xf32>
    %111 = arith.index_cast %c0_i32 : i32 to index
    %c352_51 = arith.constant 352 : index
    %c0_52 = arith.constant 0 : index
    %112 = vector.load %arg4[%111, %c352_51, %c0_52] : memref<1x392x128xf32, #tpu.memory_space<vmem>>, vector<1x32x128xf32>
    %113 = vector.shape_cast %112 : vector<1x32x128xf32> to vector<32x128xf32>
    %114 = arith.mulf %92, %113 : vector<32x128xf32>
    %cst_53 = arith.constant dense<0.000000e+00> : vector<128xf32>
    %115 = vector.multi_reduction <add>, %114, %cst_53 [0] : vector<32x128xf32> to vector<128xf32>
    %116 = vector.shape_cast %115 : vector<128xf32> to vector<1x128xf32>
    %117 = tpu.concatenate %98, %104, %110, %116 in 0 : vector<1x128xf32>, vector<1x128xf32>, vector<1x128xf32>, vector<1x128xf32> -> vector<4x128xf32>
    %118 = arith.index_cast %c0_i32 : i32 to index
    %c0_54 = arith.constant 0 : index
    %c0_55 = arith.constant 0 : index
    %119 = vector.load %arg4[%118, %c0_54, %c0_55] : memref<1x392x128xf32, #tpu.memory_space<vmem>>, vector<1x32x128xf32>
    %120 = vector.shape_cast %119 : vector<1x32x128xf32> to vector<32x128xf32>
    %121 = arith.index_cast %c0_i32 : i32 to index
    %c256_56 = arith.constant 256 : index
    %c0_57 = arith.constant 0 : index
    %122 = vector.load %arg4[%121, %c256_56, %c0_57] : memref<1x392x128xf32, #tpu.memory_space<vmem>>, vector<1x32x128xf32>
    %123 = vector.shape_cast %122 : vector<1x32x128xf32> to vector<32x128xf32>
    %124 = arith.mulf %120, %123 : vector<32x128xf32>
    %cst_58 = arith.constant dense<0.000000e+00> : vector<128xf32>
    %125 = vector.multi_reduction <add>, %124, %cst_58 [0] : vector<32x128xf32> to vector<128xf32>
    %126 = vector.shape_cast %125 : vector<128xf32> to vector<1x128xf32>
    %127 = vector.broadcast %126 : vector<1x128xf32> to vector<4x128xf32>
    %128 = arith.mulf %127, %33 : vector<4x128xf32>
    %129 = arith.index_cast %c0_i32 : i32 to index
    %c288_59 = arith.constant 288 : index
    %c0_60 = arith.constant 0 : index
    %130 = vector.load %arg4[%129, %c288_59, %c0_60] : memref<1x392x128xf32, #tpu.memory_space<vmem>>, vector<1x32x128xf32>
    %131 = vector.shape_cast %130 : vector<1x32x128xf32> to vector<32x128xf32>
    %132 = arith.mulf %120, %131 : vector<32x128xf32>
    %cst_61 = arith.constant dense<0.000000e+00> : vector<128xf32>
    %133 = vector.multi_reduction <add>, %132, %cst_61 [0] : vector<32x128xf32> to vector<128xf32>
    %134 = vector.shape_cast %133 : vector<128xf32> to vector<1x128xf32>
    %135 = vector.broadcast %134 : vector<1x128xf32> to vector<4x128xf32>
    %136 = arith.mulf %135, %61 : vector<4x128xf32>
    %137 = arith.addf %128, %136 : vector<4x128xf32>
    %138 = arith.index_cast %c0_i32 : i32 to index
    %c320_62 = arith.constant 320 : index
    %c0_63 = arith.constant 0 : index
    %139 = vector.load %arg4[%138, %c320_62, %c0_63] : memref<1x392x128xf32, #tpu.memory_space<vmem>>, vector<1x32x128xf32>
    %140 = vector.shape_cast %139 : vector<1x32x128xf32> to vector<32x128xf32>
    %141 = arith.mulf %120, %140 : vector<32x128xf32>
    %cst_64 = arith.constant dense<0.000000e+00> : vector<128xf32>
    %142 = vector.multi_reduction <add>, %141, %cst_64 [0] : vector<32x128xf32> to vector<128xf32>
    %143 = vector.shape_cast %142 : vector<128xf32> to vector<1x128xf32>
    %144 = vector.broadcast %143 : vector<1x128xf32> to vector<4x128xf32>
    %145 = arith.mulf %144, %89 : vector<4x128xf32>
    %146 = arith.addf %137, %145 : vector<4x128xf32>
    %147 = arith.index_cast %c0_i32 : i32 to index
    %c352_65 = arith.constant 352 : index
    %c0_66 = arith.constant 0 : index
    %148 = vector.load %arg4[%147, %c352_65, %c0_66] : memref<1x392x128xf32, #tpu.memory_space<vmem>>, vector<1x32x128xf32>
    %149 = vector.shape_cast %148 : vector<1x32x128xf32> to vector<32x128xf32>
    %150 = arith.mulf %120, %149 : vector<32x128xf32>
    %cst_67 = arith.constant dense<0.000000e+00> : vector<128xf32>
    %151 = vector.multi_reduction <add>, %150, %cst_67 [0] : vector<32x128xf32> to vector<128xf32>
    %152 = vector.shape_cast %151 : vector<128xf32> to vector<1x128xf32>
    %153 = vector.broadcast %152 : vector<1x128xf32> to vector<4x128xf32>
    %154 = arith.mulf %153, %117 : vector<4x128xf32>
    %155 = arith.addf %146, %154 : vector<4x128xf32>
    %cst_68 = arith.constant 0.176776692 : f32
    %156 = vector.broadcast %cst_68 : f32 to vector<4x128xf32>
    %157 = arith.mulf %155, %156 : vector<4x128xf32>
    %cst_69 = arith.constant dense<0xFF800000> : vector<128xf32>
    %158 = vector.multi_reduction <maximumf>, %157, %cst_69 [0] : vector<4x128xf32> to vector<128xf32>
    %159 = vector.shape_cast %158 : vector<128xf32> to vector<1x128xf32>
    %160 = vector.broadcast %159 : vector<1x128xf32> to vector<4x128xf32>
    %161 = arith.subf %157, %160 : vector<4x128xf32>
    %162 = math.exp %161 : vector<4x128xf32>
    %cst_70 = arith.constant dense<0.000000e+00> : vector<128xf32>
    %163 = vector.multi_reduction <add>, %162, %cst_70 [0] : vector<4x128xf32> to vector<128xf32>
    %164 = vector.shape_cast %163 : vector<128xf32> to vector<1x128xf32>
    %165 = tpu.reciprocal %164 {approx = true} : vector<1x128xf32> -> vector<1x128xf32>
    %166 = arith.mulf %164, %165 : vector<1x128xf32>
    %cst_71 = arith.constant 2.000000e+00 : f32
    %167 = vector.broadcast %cst_71 : f32 to vector<1x128xf32>
    %168 = arith.subf %167, %166 : vector<1x128xf32>
    %169 = arith.mulf %165, %168 : vector<1x128xf32>
    %170 = vector.broadcast %169 : vector<1x128xf32> to vector<4x128xf32>
    %171 = arith.mulf %162, %170 : vector<4x128xf32>
    %172 = arith.index_cast %c0_i32 : i32 to index
    %c32 = arith.constant 32 : index
    %c0_72 = arith.constant 0 : index
    %173 = vector.load %arg4[%172, %c32, %c0_72] : memref<1x392x128xf32, #tpu.memory_space<vmem>>, vector<1x32x128xf32>
    %174 = vector.shape_cast %173 : vector<1x32x128xf32> to vector<32x128xf32>
    %175 = arith.index_cast %c0_i32 : i32 to index
    %c256_73 = arith.constant 256 : index
    %c0_74 = arith.constant 0 : index
    %176 = vector.load %arg4[%175, %c256_73, %c0_74] : memref<1x392x128xf32, #tpu.memory_space<vmem>>, vector<1x32x128xf32>
    %177 = vector.shape_cast %176 : vector<1x32x128xf32> to vector<32x128xf32>
    %178 = arith.mulf %174, %177 : vector<32x128xf32>
    %cst_75 = arith.constant dense<0.000000e+00> : vector<128xf32>
    %179 = vector.multi_reduction <add>, %178, %cst_75 [0] : vector<32x128xf32> to vector<128xf32>
    %180 = vector.shape_cast %179 : vector<128xf32> to vector<1x128xf32>
    %181 = vector.broadcast %180 : vector<1x128xf32> to vector<4x128xf32>
    %182 = arith.mulf %181, %33 : vector<4x128xf32>
    %183 = arith.index_cast %c0_i32 : i32 to index
    %c288_76 = arith.constant 288 : index
    %c0_77 = arith.constant 0 : index
    %184 = vector.load %arg4[%183, %c288_76, %c0_77] : memref<1x392x128xf32, #tpu.memory_space<vmem>>, vector<1x32x128xf32>
    %185 = vector.shape_cast %184 : vector<1x32x128xf32> to vector<32x128xf32>
    %186 = arith.mulf %174, %185 : vector<32x128xf32>
    %cst_78 = arith.constant dense<0.000000e+00> : vector<128xf32>
    %187 = vector.multi_reduction <add>, %186, %cst_78 [0] : vector<32x128xf32> to vector<128xf32>
    %188 = vector.shape_cast %187 : vector<128xf32> to vector<1x128xf32>
    %189 = vector.broadcast %188 : vector<1x128xf32> to vector<4x128xf32>
    %190 = arith.mulf %189, %61 : vector<4x128xf32>
    %191 = arith.addf %182, %190 : vector<4x128xf32>
    %192 = arith.index_cast %c0_i32 : i32 to index
    %c320_79 = arith.constant 320 : index
    %c0_80 = arith.constant 0 : index
    %193 = vector.load %arg4[%192, %c320_79, %c0_80] : memref<1x392x128xf32, #tpu.memory_space<vmem>>, vector<1x32x128xf32>
    %194 = vector.shape_cast %193 : vector<1x32x128xf32> to vector<32x128xf32>
    %195 = arith.mulf %174, %194 : vector<32x128xf32>
    %cst_81 = arith.constant dense<0.000000e+00> : vector<128xf32>
    %196 = vector.multi_reduction <add>, %195, %cst_81 [0] : vector<32x128xf32> to vector<128xf32>
    %197 = vector.shape_cast %196 : vector<128xf32> to vector<1x128xf32>
    %198 = vector.broadcast %197 : vector<1x128xf32> to vector<4x128xf32>
    %199 = arith.mulf %198, %89 : vector<4x128xf32>
    %200 = arith.addf %191, %199 : vector<4x128xf32>
    %201 = arith.index_cast %c0_i32 : i32 to index
    %c352_82 = arith.constant 352 : index
    %c0_83 = arith.constant 0 : index
    %202 = vector.load %arg4[%201, %c352_82, %c0_83] : memref<1x392x128xf32, #tpu.memory_space<vmem>>, vector<1x32x128xf32>
    %203 = vector.shape_cast %202 : vector<1x32x128xf32> to vector<32x128xf32>
    %204 = arith.mulf %174, %203 : vector<32x128xf32>
    %cst_84 = arith.constant dense<0.000000e+00> : vector<128xf32>
    %205 = vector.multi_reduction <add>, %204, %cst_84 [0] : vector<32x128xf32> to vector<128xf32>
    %206 = vector.shape_cast %205 : vector<128xf32> to vector<1x128xf32>
    %207 = vector.broadcast %206 : vector<1x128xf32> to vector<4x128xf32>
    %208 = arith.mulf %207, %117 : vector<4x128xf32>
    %209 = arith.addf %200, %208 : vector<4x128xf32>
    %cst_85 = arith.constant 0.176776692 : f32
    %210 = vector.broadcast %cst_85 : f32 to vector<4x128xf32>
    %211 = arith.mulf %209, %210 : vector<4x128xf32>
    %cst_86 = arith.constant dense<0xFF800000> : vector<128xf32>
    %212 = vector.multi_reduction <maximumf>, %211, %cst_86 [0] : vector<4x128xf32> to vector<128xf32>
    %213 = vector.shape_cast %212 : vector<128xf32> to vector<1x128xf32>
    %214 = vector.broadcast %213 : vector<1x128xf32> to vector<4x128xf32>
    %215 = arith.subf %211, %214 : vector<4x128xf32>
    %216 = math.exp %215 : vector<4x128xf32>
    %cst_87 = arith.constant dense<0.000000e+00> : vector<128xf32>
    %217 = vector.multi_reduction <add>, %216, %cst_87 [0] : vector<4x128xf32> to vector<128xf32>
    %218 = vector.shape_cast %217 : vector<128xf32> to vector<1x128xf32>
    %219 = tpu.reciprocal %218 {approx = true} : vector<1x128xf32> -> vector<1x128xf32>
    %220 = arith.mulf %218, %219 : vector<1x128xf32>
    %cst_88 = arith.constant 2.000000e+00 : f32
    %221 = vector.broadcast %cst_88 : f32 to vector<1x128xf32>
    %222 = arith.subf %221, %220 : vector<1x128xf32>
    %223 = arith.mulf %219, %222 : vector<1x128xf32>
    %224 = vector.broadcast %223 : vector<1x128xf32> to vector<4x128xf32>
    %225 = arith.mulf %216, %224 : vector<4x128xf32>
    %226 = arith.addf %171, %225 : vector<4x128xf32>
    %227 = arith.index_cast %c0_i32 : i32 to index
    %c64 = arith.constant 64 : index
    %c0_89 = arith.constant 0 : index
    %228 = vector.load %arg4[%227, %c64, %c0_89] : memref<1x392x128xf32, #tpu.memory_space<vmem>>, vector<1x32x128xf32>
    %229 = vector.shape_cast %228 : vector<1x32x128xf32> to vector<32x128xf32>
    %230 = arith.index_cast %c0_i32 : i32 to index
    %c256_90 = arith.constant 256 : index
    %c0_91 = arith.constant 0 : index
    %231 = vector.load %arg4[%230, %c256_90, %c0_91] : memref<1x392x128xf32, #tpu.memory_space<vmem>>, vector<1x32x128xf32>
    %232 = vector.shape_cast %231 : vector<1x32x128xf32> to vector<32x128xf32>
    %233 = arith.mulf %229, %232 : vector<32x128xf32>
    %cst_92 = arith.constant dense<0.000000e+00> : vector<128xf32>
    %234 = vector.multi_reduction <add>, %233, %cst_92 [0] : vector<32x128xf32> to vector<128xf32>
    %235 = vector.shape_cast %234 : vector<128xf32> to vector<1x128xf32>
    %236 = vector.broadcast %235 : vector<1x128xf32> to vector<4x128xf32>
    %237 = arith.mulf %236, %33 : vector<4x128xf32>
    %238 = arith.index_cast %c0_i32 : i32 to index
    %c288_93 = arith.constant 288 : index
    %c0_94 = arith.constant 0 : index
    %239 = vector.load %arg4[%238, %c288_93, %c0_94] : memref<1x392x128xf32, #tpu.memory_space<vmem>>, vector<1x32x128xf32>
    %240 = vector.shape_cast %239 : vector<1x32x128xf32> to vector<32x128xf32>
    %241 = arith.mulf %229, %240 : vector<32x128xf32>
    %cst_95 = arith.constant dense<0.000000e+00> : vector<128xf32>
    %242 = vector.multi_reduction <add>, %241, %cst_95 [0] : vector<32x128xf32> to vector<128xf32>
    %243 = vector.shape_cast %242 : vector<128xf32> to vector<1x128xf32>
    %244 = vector.broadcast %243 : vector<1x128xf32> to vector<4x128xf32>
    %245 = arith.mulf %244, %61 : vector<4x128xf32>
    %246 = arith.addf %237, %245 : vector<4x128xf32>
    %247 = arith.index_cast %c0_i32 : i32 to index
    %c320_96 = arith.constant 320 : index
    %c0_97 = arith.constant 0 : index
    %248 = vector.load %arg4[%247, %c320_96, %c0_97] : memref<1x392x128xf32, #tpu.memory_space<vmem>>, vector<1x32x128xf32>
    %249 = vector.shape_cast %248 : vector<1x32x128xf32> to vector<32x128xf32>
    %250 = arith.mulf %229, %249 : vector<32x128xf32>
    %cst_98 = arith.constant dense<0.000000e+00> : vector<128xf32>
    %251 = vector.multi_reduction <add>, %250, %cst_98 [0] : vector<32x128xf32> to vector<128xf32>
    %252 = vector.shape_cast %251 : vector<128xf32> to vector<1x128xf32>
    %253 = vector.broadcast %252 : vector<1x128xf32> to vector<4x128xf32>
    %254 = arith.mulf %253, %89 : vector<4x128xf32>
    %255 = arith.addf %246, %254 : vector<4x128xf32>
    %256 = arith.index_cast %c0_i32 : i32 to index
    %c352_99 = arith.constant 352 : index
    %c0_100 = arith.constant 0 : index
    %257 = vector.load %arg4[%256, %c352_99, %c0_100] : memref<1x392x128xf32, #tpu.memory_space<vmem>>, vector<1x32x128xf32>
    %258 = vector.shape_cast %257 : vector<1x32x128xf32> to vector<32x128xf32>
    %259 = arith.mulf %229, %258 : vector<32x128xf32>
    %cst_101 = arith.constant dense<0.000000e+00> : vector<128xf32>
    %260 = vector.multi_reduction <add>, %259, %cst_101 [0] : vector<32x128xf32> to vector<128xf32>
    %261 = vector.shape_cast %260 : vector<128xf32> to vector<1x128xf32>
    %262 = vector.broadcast %261 : vector<1x128xf32> to vector<4x128xf32>
    %263 = arith.mulf %262, %117 : vector<4x128xf32>
    %264 = arith.addf %255, %263 : vector<4x128xf32>
    %cst_102 = arith.constant 0.176776692 : f32
    %265 = vector.broadcast %cst_102 : f32 to vector<4x128xf32>
    %266 = arith.mulf %264, %265 : vector<4x128xf32>
    %cst_103 = arith.constant dense<0xFF800000> : vector<128xf32>
    %267 = vector.multi_reduction <maximumf>, %266, %cst_103 [0] : vector<4x128xf32> to vector<128xf32>
    %268 = vector.shape_cast %267 : vector<128xf32> to vector<1x128xf32>
    %269 = vector.broadcast %268 : vector<1x128xf32> to vector<4x128xf32>
    %270 = arith.subf %266, %269 : vector<4x128xf32>
    %271 = math.exp %270 : vector<4x128xf32>
    %cst_104 = arith.constant dense<0.000000e+00> : vector<128xf32>
    %272 = vector.multi_reduction <add>, %271, %cst_104 [0] : vector<4x128xf32> to vector<128xf32>
    %273 = vector.shape_cast %272 : vector<128xf32> to vector<1x128xf32>
    %274 = tpu.reciprocal %273 {approx = true} : vector<1x128xf32> -> vector<1x128xf32>
    %275 = arith.mulf %273, %274 : vector<1x128xf32>
    %cst_105 = arith.constant 2.000000e+00 : f32
    %276 = vector.broadcast %cst_105 : f32 to vector<1x128xf32>
    %277 = arith.subf %276, %275 : vector<1x128xf32>
    %278 = arith.mulf %274, %277 : vector<1x128xf32>
    %279 = vector.broadcast %278 : vector<1x128xf32> to vector<4x128xf32>
    %280 = arith.mulf %271, %279 : vector<4x128xf32>
    %281 = arith.addf %226, %280 : vector<4x128xf32>
    %282 = arith.index_cast %c0_i32 : i32 to index
    %c96 = arith.constant 96 : index
    %c0_106 = arith.constant 0 : index
    %283 = vector.load %arg4[%282, %c96, %c0_106] : memref<1x392x128xf32, #tpu.memory_space<vmem>>, vector<1x32x128xf32>
    %284 = vector.shape_cast %283 : vector<1x32x128xf32> to vector<32x128xf32>
    %285 = arith.index_cast %c0_i32 : i32 to index
    %c256_107 = arith.constant 256 : index
    %c0_108 = arith.constant 0 : index
    %286 = vector.load %arg4[%285, %c256_107, %c0_108] : memref<1x392x128xf32, #tpu.memory_space<vmem>>, vector<1x32x128xf32>
    %287 = vector.shape_cast %286 : vector<1x32x128xf32> to vector<32x128xf32>
    %288 = arith.mulf %284, %287 : vector<32x128xf32>
    %cst_109 = arith.constant dense<0.000000e+00> : vector<128xf32>
    %289 = vector.multi_reduction <add>, %288, %cst_109 [0] : vector<32x128xf32> to vector<128xf32>
    %290 = vector.shape_cast %289 : vector<128xf32> to vector<1x128xf32>
    %291 = vector.broadcast %290 : vector<1x128xf32> to vector<4x128xf32>
    %292 = arith.mulf %291, %33 : vector<4x128xf32>
    %293 = arith.index_cast %c0_i32 : i32 to index
    %c288_110 = arith.constant 288 : index
    %c0_111 = arith.constant 0 : index
    %294 = vector.load %arg4[%293, %c288_110, %c0_111] : memref<1x392x128xf32, #tpu.memory_space<vmem>>, vector<1x32x128xf32>
    %295 = vector.shape_cast %294 : vector<1x32x128xf32> to vector<32x128xf32>
    %296 = arith.mulf %284, %295 : vector<32x128xf32>
    %cst_112 = arith.constant dense<0.000000e+00> : vector<128xf32>
    %297 = vector.multi_reduction <add>, %296, %cst_112 [0] : vector<32x128xf32> to vector<128xf32>
    %298 = vector.shape_cast %297 : vector<128xf32> to vector<1x128xf32>
    %299 = vector.broadcast %298 : vector<1x128xf32> to vector<4x128xf32>
    %300 = arith.mulf %299, %61 : vector<4x128xf32>
    %301 = arith.addf %292, %300 : vector<4x128xf32>
    %302 = arith.index_cast %c0_i32 : i32 to index
    %c320_113 = arith.constant 320 : index
    %c0_114 = arith.constant 0 : index
    %303 = vector.load %arg4[%302, %c320_113, %c0_114] : memref<1x392x128xf32, #tpu.memory_space<vmem>>, vector<1x32x128xf32>
    %304 = vector.shape_cast %303 : vector<1x32x128xf32> to vector<32x128xf32>
    %305 = arith.mulf %284, %304 : vector<32x128xf32>
    %cst_115 = arith.constant dense<0.000000e+00> : vector<128xf32>
    %306 = vector.multi_reduction <add>, %305, %cst_115 [0] : vector<32x128xf32> to vector<128xf32>
    %307 = vector.shape_cast %306 : vector<128xf32> to vector<1x128xf32>
    %308 = vector.broadcast %307 : vector<1x128xf32> to vector<4x128xf32>
    %309 = arith.mulf %308, %89 : vector<4x128xf32>
    %310 = arith.addf %301, %309 : vector<4x128xf32>
    %311 = arith.index_cast %c0_i32 : i32 to index
    %c352_116 = arith.constant 352 : index
    %c0_117 = arith.constant 0 : index
    %312 = vector.load %arg4[%311, %c352_116, %c0_117] : memref<1x392x128xf32, #tpu.memory_space<vmem>>, vector<1x32x128xf32>
    %313 = vector.shape_cast %312 : vector<1x32x128xf32> to vector<32x128xf32>
    %314 = arith.mulf %284, %313 : vector<32x128xf32>
    %cst_118 = arith.constant dense<0.000000e+00> : vector<128xf32>
    %315 = vector.multi_reduction <add>, %314, %cst_118 [0] : vector<32x128xf32> to vector<128xf32>
    %316 = vector.shape_cast %315 : vector<128xf32> to vector<1x128xf32>
    %317 = vector.broadcast %316 : vector<1x128xf32> to vector<4x128xf32>
    %318 = arith.mulf %317, %117 : vector<4x128xf32>
    %319 = arith.addf %310, %318 : vector<4x128xf32>
    %cst_119 = arith.constant 0.176776692 : f32
    %320 = vector.broadcast %cst_119 : f32 to vector<4x128xf32>
    %321 = arith.mulf %319, %320 : vector<4x128xf32>
    %cst_120 = arith.constant dense<0xFF800000> : vector<128xf32>
    %322 = vector.multi_reduction <maximumf>, %321, %cst_120 [0] : vector<4x128xf32> to vector<128xf32>
    %323 = vector.shape_cast %322 : vector<128xf32> to vector<1x128xf32>
    %324 = vector.broadcast %323 : vector<1x128xf32> to vector<4x128xf32>
    %325 = arith.subf %321, %324 : vector<4x128xf32>
    %326 = math.exp %325 : vector<4x128xf32>
    %cst_121 = arith.constant dense<0.000000e+00> : vector<128xf32>
    %327 = vector.multi_reduction <add>, %326, %cst_121 [0] : vector<4x128xf32> to vector<128xf32>
    %328 = vector.shape_cast %327 : vector<128xf32> to vector<1x128xf32>
    %329 = tpu.reciprocal %328 {approx = true} : vector<1x128xf32> -> vector<1x128xf32>
    %330 = arith.mulf %328, %329 : vector<1x128xf32>
    %cst_122 = arith.constant 2.000000e+00 : f32
    %331 = vector.broadcast %cst_122 : f32 to vector<1x128xf32>
    %332 = arith.subf %331, %330 : vector<1x128xf32>
    %333 = arith.mulf %329, %332 : vector<1x128xf32>
    %334 = vector.broadcast %333 : vector<1x128xf32> to vector<4x128xf32>
    %335 = arith.mulf %326, %334 : vector<4x128xf32>
    %336 = arith.addf %281, %335 : vector<4x128xf32>
    %337 = arith.index_cast %c0_i32 : i32 to index
    %c384 = arith.constant 384 : index
    %c0_123 = arith.constant 0 : index
    %338 = vector.load %arg4[%337, %c384, %c0_123] : memref<1x392x128xf32, #tpu.memory_space<vmem>>, vector<1x4x128xf32>
    %339 = vector.shape_cast %338 : vector<1x4x128xf32> to vector<4x128xf32>
    %340 = arith.mulf %339, %336 : vector<4x128xf32>
    %cst_124 = arith.constant dense<0.000000e+00> : vector<128xf32>
    %341 = vector.multi_reduction <add>, %340, %cst_124 [0] : vector<4x128xf32> to vector<128xf32>
    %342 = vector.shape_cast %341 : vector<128xf32> to vector<1x128xf32>
    %c0_125 = arith.constant 0 : index
    %343 = arith.index_cast %c0_i32 : i32 to index
    %c0_126 = arith.constant 0 : index
    %344 = vector.load %arg3[%c0_125, %343, %c0_126] : memref<1x1x128xf32, #tpu.memory_space<vmem>>, vector<1x1x128xf32>
    %345 = vector.shape_cast %344 : vector<1x1x128xf32> to vector<1x128xf32>
    %346 = vector.shape_cast %342 : vector<1x128xf32> to vector<1x1x128xf32>
    tpu.vector_store %arg3[%c0_125, %343, %c0_126], %346 {strides = array<i32>} : memref<1x1x128xf32, #tpu.memory_space<vmem>>, vector<1x1x128xf32>,
    %c1_i32 = arith.constant 1 : i32
    return
  }
  func.func @transform_0(%arg0: i32) -> (i32, i32) {
    %c0_i32 = arith.constant 0 : i32
    %c0_i32_0 = arith.constant 0 : i32
    return %c0_i32, %arg0 : i32, i32
  }
  func.func @transform_1(%arg0: i32) -> (i32, i32) {
    %c0_i32 = arith.constant 0 : i32
    %c0_i32_0 = arith.constant 0 : i32
    %c0_i32_1 = arith.constant 0 : i32
    return %c0_i32, %c0_i32_0 : i32, i32
  }
  func.func @transform_2(%arg0: i32) -> (i32, i32, i32) {
    %c0_i32 = arith.constant 0 : i32
    %c0_i32_0 = arith.constant 0 : i32
    %c0_i32_1 = arith.constant 0 : i32
    return %arg0, %c0_i32, %c0_i32_0 : i32, i32, i32
  }
}

</mosaic_0001>

<bundles_post_ra>
// kernel: tpu_custom_call.1
= control target key start
LH: loop header
LB: loop body
LE: loop exit
PB: predicated region body
PF: predicated region fallthrough
CT: control target
= control target key end

     0   :  { %v1511_v1 = vmov 0.0   ;;  %vm66_vm0 = vcmask 326656   ;;  %vm1512_vm1 = vmmov 0   ;;  %s2385_s0 = inlined_call_operand.vmem [shape: f32[40,128], index: 0, kind: input, shape index: {}]   ;;  %s2386_s1 = inlined_call_operand.vmem [shape: f32[392,40], index: 1, kind: input, shape index: {}]   ;;  %s2387_s2 = inlined_call_operand.hbm [shape: f32[1,1,128], index: 2, kind: output, shape index: {}]  }
   0x1   :  { %v65_v0 = vld [vmem:[%s2385_s0 + $0x20] sm:$0xff]  ;;  %1303 = vmatprep.subr.mxu0 %v1511_v1  ;;  %1460 = vmatprep.subr.mxu1 %v1511_v1  ;;  %v64_v2 = vld [vmem:[%s2385_s0 + $0x18] sm:$0xff]  ;;  %v63_v3 = vld [vmem:[%s2385_s0 + $0x10] sm:$0xff] }
   0x2   :  { %1304 = vmatpush3.msra.mxu0 %v65_v0  ;;  %1465 = vmatpush3.msra.mxu1 %v65_v0  ;;  %v62_v4 = vld [vmem:[%s2385_s0 + $0x8] sm:$0xff]  ;;  %v61_v5 = vld [vmem:[%s2385_s0] sm:$0xff]  ;;  %v38_v9 = vld [vmem:[%s2386_s1 + $0xd0] sm:$0xff] }
   0x3   :  { %1305 = vmatprep.subr.mxu0 %v1511_v1  ;;  %1461 = vmatprep.subr.mxu1 %v1511_v1  ;;  %v12_v6 = vld [vmem:[%s2386_s1] sm:$0xff]  ;;  %v37_v7 = vld [vmem:[%s2386_s1 + $0xc8] sm:$0xff]  ;;  %v14_v10 = vld [vmem:[%s2386_s1 + $0x10] sm:$0xff] }
   0x4   :  { %1306 = vmatpush3.msra.mxu0 %v64_v2  ;;  %1466 = vmatpush3.msra.mxu1 %v64_v2  ;;  %v13_v8 = vld [vmem:[%s2386_s1 + $0x8] sm:$0xff]  ;;  %v39_v11 = vld [vmem:[%s2386_s1 + $0xd8] sm:$0xff] }
   0x5   :  { %1307 = vmatprep.subr.mxu0 %v1511_v1  ;;  %1462 = vmatprep.subr.mxu1 %v1511_v1 }
   0x6   :  { %1308 = vmatpush3.msra.mxu0 %v63_v3  ;;  %1467 = vmatpush3.msra.mxu1 %v63_v3 }
   0x7   :  { %1309 = vmatprep.subr.mxu0 %v1511_v1  ;;  %1463 = vmatprep.subr.mxu1 %v1511_v1 }
   0x8   :  { %1310 = vmatpush3.msra.mxu0 %v62_v4  ;;  %1468 = vmatpush3.msra.mxu1 %v62_v4 }
   0x9   :  { %1311 = vmatprep.subr.mxu0 %v1511_v1  ;;  %1464 = vmatprep.subr.mxu1 %v1511_v1 }
   0xa   :  { %1312 = vmatpush3.msra.mxu0 %v61_v5  ;;  %1469 = vmatpush3.msra.mxu1 %v61_v5 }
   0xb   :  { %1313 = vmatprep.mubr.msk.f32.mxu0 %vm1512_vm1, %v1511_v1  ;;  %1388 = vmatprep.mubr.msk.f32.mxu1 %vm1512_vm1, %v1511_v1 }
   0xc   :  { %1314 = vmatmul.mubr.msk.f32.vlgmr.msra.gmra.mxu0 %vm66_vm0, %v12_v6  ;;  %1389 = vmatmul.mubr.msk.f32.vlgmr.msra.gmra.mxu1 %vm66_vm0, %v37_v7 }
   0xd   :  { %1316 = vmatprep.mubr.msk.f32.mxu0 %vm1512_vm1, %v1511_v1  ;;  %1391 = vmatprep.mubr.msk.f32.mxu1 %vm1512_vm1, %v1511_v1 }
  0x10   :  { %1317 = vmatmul.mubr.msk.f32.gmra.mxu0 %vm66_vm0, %v13_v8  ;;  %1392 = vmatmul.mubr.msk.f32.gmra.mxu1 %vm66_vm0, %v38_v9 }
  0x11   :  { %1319 = vmatprep.mubr.msk.f32.mxu0 %vm1512_vm1, %v1511_v1  ;;  %1394 = vmatprep.mubr.msk.f32.mxu1 %vm1512_vm1, %v1511_v1 }
  0x12   :  { %7 = vsyncpa [#allocation4], 0  ;;  %v15_v12 = vld [vmem:[%s2386_s1 + $0x18] sm:$0xff]  ;;  %v40_v13 = vld [vmem:[%s2386_s1 + $0xe0] sm:$0xff]  ;;  %vm645_vm2 = vcmask 1040384   ;;  %vm647_vm3 = vcmask 1041408  }
  0x13   :  { %v16_v14 = vld [vmem:[%s2386_s1 + $0x20] sm:$0xff]  ;;  %v41_v15 = vld [vmem:[%s2386_s1 + $0xe8] sm:$0xff]  ;;  %v42_v17 = vld [vmem:[%s2386_s1 + $0xf0] sm:$0xff]  ;;  %vm649_vm4 = vcmask 1042432   ;;  %vm892_vm5 = vcmask 1043456  }
  0x14   :  { %1320 = vmatmul.mubr.msk.f32.gmra.mxu0 %vm66_vm0, %v14_v10  ;;  %1395 = vmatmul.mubr.msk.f32.gmra.mxu1 %vm66_vm0, %v39_v11  ;;  %v17_v16 = vld [vmem:[%s2386_s1 + $0x28] sm:$0xff]  ;;  %v18_v18 = vld [vmem:[%s2386_s1 + $0x30] sm:$0xff]  ;;  %v43_v19 = vld [vmem:[%s2386_s1 + $0xf8] sm:$0xff] }
  0x15   :  { %1322 = vmatprep.mubr.msk.f32.mxu0 %vm1512_vm1, %v1511_v1  ;;  %1397 = vmatprep.mubr.msk.f32.mxu1 %vm1512_vm1, %v1511_v1  ;;  %v19_v20 = vld [vmem:[%s2386_s1 + $0x38] sm:$0xff]  ;;  %v44_v21 = vld [vmem:[%s2386_s1 + $0x100] sm:$0xff]  ;;  %v45_v23 = vld [vmem:[%s2386_s1 + $0x108] sm:$0xff] }
  0x16   :  { %v20_v22 = vld [vmem:[%s2386_s1 + $0x40] sm:$0xff]  ;;  %v21_v24 = vld [vmem:[%s2386_s1 + $0x48] sm:$0xff]  ;;  %v46_v25 = vld [vmem:[%s2386_s1 + $0x110] sm:$0xff] }
  0x17   :  { %v22_v26 = vld [vmem:[%s2386_s1 + $0x50] sm:$0xff]  ;;  %v47_v27 = vld [vmem:[%s2386_s1 + $0x118] sm:$0xff]  ;;  %v48_v29 = vld [vmem:[%s2386_s1 + $0x120] sm:$0xff] }
  0x18   :  { %1323 = vmatmul.mubr.msk.f32.gmra.mxu0 %vm66_vm0, %v15_v12  ;;  %1398 = vmatmul.mubr.msk.f32.gmra.mxu1 %vm66_vm0, %v40_v13  ;;  %v23_v28 = vld [vmem:[%s2386_s1 + $0x58] sm:$0xff]  ;;  %v24_v30 = vld [vmem:[%s2386_s1 + $0x60] sm:$0xff]  ;;  %v49_v31 = vld [vmem:[%s2386_s1 + $0x128] sm:$0xff] }
  0x19   :  { %1325 = vmatprep.mubr.msk.f32.mxu0 %vm1512_vm1, %v1511_v1  ;;  %1400 = vmatprep.mubr.msk.f32.mxu1 %vm1512_vm1, %v1511_v1  ;;  %v25_v32 = vld [vmem:[%s2386_s1 + $0x68] sm:$0xff]  ;;  %v50_v33 = vld [vmem:[%s2386_s1 + $0x130] sm:$0xff]  ;;  %v51_v35 = vld [vmem:[%s2386_s1 + $0x138] sm:$0xff] }
  0x1a   :  { %v26_v34 = vld [vmem:[%s2386_s1 + $0x70] sm:$0xff]  ;;  %v27_v36 = vld [vmem:[%s2386_s1 + $0x78] sm:$0xff]  ;;  %v52_v37 = vld [vmem:[%s2386_s1 + $0x140] sm:$0xff] }
  0x1b   :  { %v28_v38 = vld [vmem:[%s2386_s1 + $0x80] sm:$0xff]  ;;  %v53_v39 = vld [vmem:[%s2386_s1 + $0x148] sm:$0xff]  ;;  %v54_v41 = vld [vmem:[%s2386_s1 + $0x150] sm:$0xff] }
  0x1c   :  { %1326 = vmatmul.mubr.msk.f32.gmra.mxu0 %vm66_vm0, %v16_v14  ;;  %1401 = vmatmul.mubr.msk.f32.gmra.mxu1 %vm66_vm0, %v41_v15  ;;  %v29_v40 = vld [vmem:[%s2386_s1 + $0x88] sm:$0xff]  ;;  %v30_v42 = vld [vmem:[%s2386_s1 + $0x90] sm:$0xff]  ;;  %v55_v43 = vld [vmem:[%s2386_s1 + $0x158] sm:$0xff] }
  0x1d   :  { %1328 = vmatprep.mubr.msk.f32.mxu0 %vm1512_vm1, %v1511_v1  ;;  %1403 = vmatprep.mubr.msk.f32.mxu1 %vm1512_vm1, %v1511_v1  ;;  %v31_v44 = vld [vmem:[%s2386_s1 + $0x98] sm:$0xff]  ;;  %v56_v45 = vld [vmem:[%s2386_s1 + $0x160] sm:$0xff]  ;;  %v57_v47 = vld [vmem:[%s2386_s1 + $0x168] sm:$0xff] }
  0x1e   :  { %v32_v46 = vld [vmem:[%s2386_s1 + $0xa0] sm:$0xff]  ;;  %v33_v48 = vld [vmem:[%s2386_s1 + $0xa8] sm:$0xff]  ;;  %v58_v49 = vld [vmem:[%s2386_s1 + $0x170] sm:$0xff] }
  0x1f   :  { %v34_v50 = vld [vmem:[%s2386_s1 + $0xb0] sm:$0xff]  ;;  %v59_v51 = vld [vmem:[%s2386_s1 + $0x178] sm:$0xff]  ;;  %v60_v53 = vld [vmem:[%s2386_s1 + $0x180] sm:$0xff] }
  0x20   :  { %1329 = vmatmul.mubr.msk.f32.gmra.mxu0 %vm66_vm0, %v17_v16  ;;  %1404 = vmatmul.mubr.msk.f32.gmra.mxu1 %vm66_vm0, %v42_v17  ;;  %v35_v52 = vld [vmem:[%s2386_s1 + $0xb8] sm:$0xff]  ;;  %v36_v54 = vld [vmem:[%s2386_s1 + $0xc0] sm:$0xff]  ;;  %s1513_s1 = smov [#allocation3]  }
  0x21   :  { %1331 = vmatprep.mubr.msk.f32.mxu0 %vm1512_vm1, %v1511_v1  ;;  %1406 = vmatprep.mubr.msk.f32.mxu1 %vm1512_vm1, %v1511_v1  ;;  %s1192_s29 = sshll.u32 %s1513_s1, 4  ;;  %s1193_s29 = int_to_ptr.vmem [resolvable:$true] %s1192_s29 }
  0x22   :  { %s1489_s30 = scalar_lea.vmem %s1193_s29, 16  ;;  %s1493_s3 = scalar_lea.vmem %s1193_s29, 32 }
  0x23   :  { %p1490_p0 = scmp.ne.s32.totalorder %s1193_s29, %s1489_s30  ;;  %p1494_p1 = scmp.lt.s32.totalorder %s1193_s29, %s1193_s29 }
  0x24   :  { %1332 = vmatmul.mubr.msk.f32.gmra.mxu0 %vm66_vm0, %v18_v18  ;;  %1407 = vmatmul.mubr.msk.f32.gmra.mxu1 %vm66_vm0, %v43_v19  ;;  %p1495_p2 = scmp.lt.s32.totalorder %s1493_s3, %s1489_s30 }
  0x25   :  { %1334 = vmatprep.mubr.msk.f32.mxu0 %vm1512_vm1, %v1511_v1  ;;  %1409 = vmatprep.mubr.msk.f32.mxu1 %vm1512_vm1, %v1511_v1 }
  0x26   :  { %p1496_p3 = por %p1495_p2, %p1494_p1 }
  0x28   :  { %1335 = vmatmul.mubr.msk.f32.gmra.mxu0 %vm66_vm0, %v19_v20  ;;  %1410 = vmatmul.mubr.msk.f32.gmra.mxu1 %vm66_vm0, %v44_v21  ;;  %p1497_p4 = pnand %p1496_p3, %p1490_p0 }
  0x29   :  { %1337 = vmatprep.mubr.msk.f32.mxu0 %vm1512_vm1, %v1511_v1  ;;  %1412 = vmatprep.mubr.msk.f32.mxu1 %vm1512_vm1, %v1511_v1 }
  0x2c   :  { %1338 = vmatmul.mubr.msk.f32.gmra.mxu0 %vm66_vm0, %v20_v22  ;;  %1413 = vmatmul.mubr.msk.f32.gmra.mxu1 %vm66_vm0, %v45_v23 }
  0x2d   :  { %1340 = vmatprep.mubr.msk.f32.mxu0 %vm1512_vm1, %v1511_v1  ;;  %1415 = vmatprep.mubr.msk.f32.mxu1 %vm1512_vm1, %v1511_v1 }
  0x30   :  { %1341 = vmatmul.mubr.msk.f32.gmra.mxu0 %vm66_vm0, %v21_v24  ;;  %1416 = vmatmul.mubr.msk.f32.gmra.mxu1 %vm66_vm0, %v46_v25 }
  0x31   :  { %1343 = vmatprep.mubr.msk.f32.mxu0 %vm1512_vm1, %v1511_v1  ;;  %1418 = vmatprep.mubr.msk.f32.mxu1 %vm1512_vm1, %v1511_v1 }
  0x34   :  { %1344 = vmatmul.mubr.msk.f32.gmra.mxu0 %vm66_vm0, %v22_v26  ;;  %1419 = vmatmul.mubr.msk.f32.gmra.mxu1 %vm66_vm0, %v47_v27 }
  0x35   :  { %1346 = vmatprep.mubr.msk.f32.mxu0 %vm1512_vm1, %v1511_v1  ;;  %1421 = vmatprep.mubr.msk.f32.mxu1 %vm1512_vm1, %v1511_v1 }
  0x38   :  { %1347 = vmatmul.mubr.msk.f32.gmra.mxu0 %vm66_vm0, %v23_v28  ;;  %1422 = vmatmul.mubr.msk.f32.gmra.mxu1 %vm66_vm0, %v48_v29 }
  0x39   :  { %1349 = vmatprep.mubr.msk.f32.mxu0 %vm1512_vm1, %v1511_v1  ;;  %1424 = vmatprep.mubr.msk.f32.mxu1 %vm1512_vm1, %v1511_v1 }
  0x3c   :  { %1350 = vmatmul.mubr.msk.f32.gmra.mxu0 %vm66_vm0, %v24_v30  ;;  %1425 = vmatmul.mubr.msk.f32.gmra.mxu1 %vm66_vm0, %v49_v31 }
  0x3d   :  { %1352 = vmatprep.mubr.msk.f32.mxu0 %vm1512_vm1, %v1511_v1  ;;  %1427 = vmatprep.mubr.msk.f32.mxu1 %vm1512_vm1, %v1511_v1 }
  0x40   :  { %1353 = vmatmul.mubr.msk.f32.gmra.mxu0 %vm66_vm0, %v25_v32  ;;  %1428 = vmatmul.mubr.msk.f32.gmra.mxu1 %vm66_vm0, %v50_v33 }
  0x41   :  { %1355 = vmatprep.mubr.msk.f32.mxu0 %vm1512_vm1, %v1511_v1  ;;  %1430 = vmatprep.mubr.msk.f32.mxu1 %vm1512_vm1, %v1511_v1 }
  0x44   :  { %1356 = vmatmul.mubr.msk.f32.gmra.mxu0 %vm66_vm0, %v26_v34  ;;  %1431 = vmatmul.mubr.msk.f32.gmra.mxu1 %vm66_vm0, %v51_v35 }
  0x45   :  { %1358 = vmatprep.mubr.msk.f32.mxu0 %vm1512_vm1, %v1511_v1  ;;  %1433 = vmatprep.mubr.msk.f32.mxu1 %vm1512_vm1, %v1511_v1 }
  0x48   :  { %1359 = vmatmul.mubr.msk.f32.gmra.mxu0 %vm66_vm0, %v27_v36  ;;  %1434 = vmatmul.mubr.msk.f32.gmra.mxu1 %vm66_vm0, %v52_v37 }
  0x49   :  { %1361 = vmatprep.mubr.msk.f32.mxu0 %vm1512_vm1, %v1511_v1  ;;  %1436 = vmatprep.mubr.msk.f32.mxu1 %vm1512_vm1, %v1511_v1 }
  0x4c   :  { %1362 = vmatmul.mubr.msk.f32.gmra.mxu0 %vm66_vm0, %v28_v38  ;;  %1437 = vmatmul.mubr.msk.f32.gmra.mxu1 %vm66_vm0, %v53_v39 }
  0x4d   :  { %1364 = vmatprep.mubr.msk.f32.mxu0 %vm1512_vm1, %v1511_v1  ;;  %1439 = vmatprep.mubr.msk.f32.mxu1 %vm1512_vm1, %v1511_v1 }
  0x50   :  { %1365 = vmatmul.mubr.msk.f32.gmra.mxu0 %vm66_vm0, %v29_v40  ;;  %1440 = vmatmul.mubr.msk.f32.gmra.mxu1 %vm66_vm0, %v54_v41 }
  0x51   :  { %1367 = vmatprep.mubr.msk.f32.mxu0 %vm1512_vm1, %v1511_v1  ;;  %1442 = vmatprep.mubr.msk.f32.mxu1 %vm1512_vm1, %v1511_v1 }
  0x54   :  { %1368 = vmatmul.mubr.msk.f32.gmra.mxu0 %vm66_vm0, %v30_v42  ;;  %1443 = vmatmul.mubr.msk.f32.gmra.mxu1 %vm66_vm0, %v55_v43 }
  0x55   :  { %1370 = vmatprep.mubr.msk.f32.mxu0 %vm1512_vm1, %v1511_v1  ;;  %1445 = vmatprep.mubr.msk.f32.mxu1 %vm1512_vm1, %v1511_v1 }
  0x58   :  { %1371 = vmatmul.mubr.msk.f32.gmra.mxu0 %vm66_vm0, %v31_v44  ;;  %1446 = vmatmul.mubr.msk.f32.gmra.mxu1 %vm66_vm0, %v56_v45 }
  0x59   :  { %1373 = vmatprep.mubr.msk.f32.mxu0 %vm1512_vm1, %v1511_v1  ;;  %1448 = vmatprep.mubr.msk.f32.mxu1 %vm1512_vm1, %v1511_v1 }
  0x5c   :  { %1374 = vmatmul.mubr.msk.f32.gmra.mxu0 %vm66_vm0, %v32_v46  ;;  %1449 = vmatmul.mubr.msk.f32.gmra.mxu1 %vm66_vm0, %v57_v47 }
  0x5d   :  { %1376 = vmatprep.mubr.msk.f32.mxu0 %vm1512_vm1, %v1511_v1  ;;  %1451 = vmatprep.mubr.msk.f32.mxu1 %vm1512_vm1, %v1511_v1 }
  0x60   :  { %1377 = vmatmul.mubr.msk.f32.gmra.mxu0 %vm66_vm0, %v33_v48  ;;  %1452 = vmatmul.mubr.msk.f32.gmra.mxu1 %vm66_vm0, %v58_v49 }
  0x61   :  { %1379 = vmatprep.mubr.msk.f32.mxu0 %vm1512_vm1, %v1511_v1  ;;  %1454 = vmatprep.mubr.msk.f32.mxu1 %vm1512_vm1, %v1511_v1 }
  0x64   :  { %1380 = vmatmul.mubr.msk.f32.gmra.mxu0 %vm66_vm0, %v34_v50  ;;  %1455 = vmatmul.mubr.msk.f32.gmra.mxu1 %vm66_vm0, %v59_v51 }
  0x65   :  { %1382 = vmatprep.mubr.msk.f32.mxu0 %vm1512_vm1, %v1511_v1  ;;  %1457 = vmatprep.mubr.msk.f32.mxu1 %vm1512_vm1, %v1511_v1 }
  0x68   :  { %1383 = vmatmul.mubr.msk.f32.gmra.mxu0 %vm66_vm0, %v35_v52  ;;  %1458 = vmatmul.mubr.msk.f32.gmra.mxu1 %vm66_vm0, %v60_v53 }
  0x69   :  { %1385 = vmatprep.mubr.msk.f32.mxu0 %vm1512_vm1, %v1511_v1 }
  0x6c   :  { %1386 = vmatmul.mubr.msk.f32.gmra.mxu0 %vm66_vm0, %v36_v54 }
  0xcc   :  { %v1848_v55 = vpop.f32.mrf.mxu0  ;;  %v1850_v56 = vpop.f32.mrf.mxu1 }
  0xce   :  { %v1315_v57 = vpop.f32.mrf.mxu0  ;;  %v1390_v58 = vpop.f32.mrf.mxu1 }
  0xd0   :  { %v1852_v59 = vpop.f32.mrf.mxu0  ;;  %v1854_v60 = vpop.f32.mrf.mxu1 }
  0xd2   :  { %v1318_v61 = vpop.f32.mrf.mxu0  ;;  %v1393_v62 = vpop.f32.mrf.mxu1 }
  0xd4   :  { %v1856_v63 = vpop.f32.mrf.mxu0  ;;  %v1858_v0 = vpop.f32.mrf.mxu1 }
  0xd6   :  { %v1321_v1 = vpop.f32.mrf.mxu0  ;;  %v1396_v2 = vpop.f32.mrf.mxu1 }
  0xd8   :  { %v1860_v3 = vpop.f32.mrf.mxu0  ;;  %v1862_v4 = vpop.f32.mrf.mxu1 }
  0xd9   :  { %2406 = vst [vmem:[#allocation6_spill] sm:$0xff] %v1860_v3 }
  0xda   :  { %v1324_v5 = vpop.f32.mrf.mxu0  ;;  %v1399_v6 = vpop.f32.mrf.mxu1 }
  0xdc   :  { %v1864_v7 = vpop.f32.mrf.mxu0  ;;  %v1866_v8 = vpop.f32.mrf.mxu1 }
  0xde   :  { %v1327_v9 = vpop.f32.mrf.mxu0  ;;  %v1402_v10 = vpop.f32.mrf.mxu1 }
  0xe0   :  { %v1868_v11 = vpop.f32.mrf.mxu0  ;;  %v1870_v12 = vpop.f32.mrf.mxu1 }
  0xe2   :  { %v1330_v13 = vpop.f32.mrf.mxu0  ;;  %v1405_v14 = vpop.f32.mrf.mxu1 }
  0xe4   :  { %v1872_v15 = vpop.f32.mrf.mxu0  ;;  %v1874_v16 = vpop.f32.mrf.mxu1 }
  0xe6   :  { %v1333_v17 = vpop.f32.mrf.mxu0  ;;  %v1408_v18 = vpop.f32.mrf.mxu1 }
  0xe8   :  { %v1876_v19 = vpop.f32.mrf.mxu0  ;;  %v1878_v20 = vpop.f32.mrf.mxu1 }
  0xe9   :  { %2407 = vst [vmem:[#allocation7_spill] sm:$0xff] %v1876_v19  ;;  %v919_v25 = vmul.f32 %v1878_v20, %v1864_v7  ;;  %v773_v29 = vmul.f32 %v1878_v20, %v1862_v4  ;;  %v832_v30 = vmul.f32 %v1878_v20, %v1848_v55 }
  0xea   :  { %v1336_v21 = vpop.f32.mrf.mxu0  ;;  %v1411_v22 = vpop.f32.mrf.mxu1 }
  0xec   :  { %v1880_v23 = vpop.f32.mrf.mxu0  ;;  %v1882_v24 = vpop.f32.mrf.mxu1 }
  0xed   :  { %v774_v26 = vmul.f32 %v1882_v24, %v1866_v8  ;;  %v833_v27 = vmul.f32 %v1882_v24, %v1852_v59  ;;  %v920_v28 = vmul.f32 %v1882_v24, %v1868_v11  ;;  %v1006_v34 = vmul.f32 %v1878_v20, %v1880_v23 }
  0xee   :  { %v1339_v31 = vpop.f32.mrf.mxu0  ;;  %v1414_v32 = vpop.f32.mrf.mxu1  ;;  %v1932_v13 = vmul.f32 %v1882_v24, %v1850_v56 }
  0xef   :  { %v923_v33 = vadd.f32 %v920_v28, %v919_v25  ;;  %v777_v35 = vadd.f32 %v774_v26, %v773_v29  ;;  %v836_v36 = vadd.f32 %v833_v27, %v832_v30 }
  0xf0   :  { %v1898_v37 = vpop.f32.mrf.mxu0  ;;  %v1900_v38 = vpop.f32.mrf.mxu1 }
  0xf1   :  { %v1007_v39 = vmul.f32 %v1882_v24, %v1898_v37  ;;  %v775_v40 = vmul.f32 %v1900_v38, %v1870_v12  ;;  %v834_v41 = vmul.f32 %v1900_v38, %v1856_v63  ;;  %v921_v42 = vmul.f32 %v1900_v38, %v1872_v15 }
  0xf2   :  { %v1342_v43 = vpop.f32.mrf.mxu0  ;;  %v1417_v44 = vpop.f32.mrf.mxu1  ;;  %v1940_v28 = vmul.f32 %v1900_v38, %v1854_v60 }
  0xf3   :  { %v1010_v45 = vadd.f32 %v1007_v39, %v1006_v34  ;;  %v778_v46 = vadd.f32 %v777_v35, %v775_v40  ;;  %v837_v47 = vadd.f32 %v836_v36, %v834_v41  ;;  %v924_v48 = vadd.f32 %v923_v33, %v921_v42 }
  0xf4   :  { %v1910_v49 = vpop.f32.mrf.mxu0  ;;  %v1912_v50 = vpop.f32.mrf.mxu1  ;;  %2410 = vst [vmem:[#allocation10_spill] sm:$0xff] %v1940_v28 }
  0xf5   :  { %2408 = vst [vmem:[#allocation8_spill] sm:$0xff] %v1910_v49  ;;  %v1008_v51 = vmul.f32 %v1900_v38, %v1910_v49  ;;  %v776_v52 = vmul.f32 %v1912_v50, %v1874_v16  ;;  %v835_v53 = vmul.f32 %v1912_v50, %v1860_v3  ;;  %v922_v54 = vmul.f32 %v1912_v50, %v1876_v19 }
  0xf6   :  { %v1345_v57 = vpop.f32.mrf.mxu0  ;;  %v1420_v58 = vpop.f32.mrf.mxu1  ;;  %v1944_v29 = vmul.f32 %v1912_v50, %v1858_v0 }
  0xf7   :  { %v1011_v61 = vadd.f32 %v1010_v45, %v1008_v51  ;;  %v779_v62 = vadd.f32 %v778_v46, %v776_v52  ;;  %v838_v1 = vadd.f32 %v837_v47, %v835_v53  ;;  %v925_v2 = vadd.f32 %v924_v48, %v922_v54 }
  0xf8   :  { %v1922_v5 = vpop.f32.mrf.mxu0  ;;  %v1924_v6 = vpop.f32.mrf.mxu1  ;;  %2411 = vst [vmem:[#allocation11_spill] sm:$0xff] %v1944_v29 }
  0xf9   :  { %2409 = vst [vmem:[#allocation9_spill] sm:$0xff] %v1922_v5  ;;  %v1009_v9 = vmul.f32 %v1912_v50, %v1922_v5  ;;  %v933_v10 = vmul.f32 %v1924_v6, %v1864_v7  ;;  %v1020_v14 = vmul.f32 %v1924_v6, %v1880_v23  ;;  %v780_v21 = vrot.slane %v779_v62, 4 }
  0xfa   :  { %v1348_v17 = vpop.f32.mrf.mxu0  ;;  %v1423_v18 = vpop.f32.mrf.mxu1  ;;  %v839_v22 = vrot.slane %v838_v1, 4  ;;  %v926_v25 = vrot.slane %v925_v2, 4  ;;  %v786_v27 = vmul.f32 %v1924_v6, %v1862_v4  ;;  %v846_v30 = vmul.f32 %v1924_v6, %v1848_v55 }
  0xfb   :  { %v1012_v26 = vadd.f32 %v1011_v61, %v1009_v9  ;;  %v781_v33 = vadd.f32 %v780_v21, %v779_v62 }
  0xfc   :  { %v1948_v31 = vpop.f32.mrf.mxu0  ;;  %v1950_v32 = vpop.f32.mrf.mxu1  ;;  %v840_v34 = vadd.f32 %v839_v22, %v838_v1  ;;  %v927_v35 = vadd.f32 %v926_v25, %v925_v2 }
  0xfd   :  { %2412 = vst [vmem:[#allocation12_spill] sm:$0xff] %v1948_v31  ;;  %v1013_v36 = vrot.slane %v1012_v26, 4  ;;  %v1093_v39 = vmul.f32 %v1878_v20, %v1948_v31  ;;  %v1107_v40 = vmul.f32 %v1924_v6, %v1948_v31  ;;  %v787_v41 = vmul.f32 %v1950_v32, %v1866_v8 }
  0xfe   :  { %v847_v42 = vmul.f32 %v1950_v32, %v1852_v59  ;;  %v934_v43 = vmul.f32 %v1950_v32, %v1868_v11  ;;  %v1021_v44 = vmul.f32 %v1950_v32, %v1898_v37  ;;  %v1351_v45 = vpop.f32.mrf.mxu0  ;;  %v1426_v46 = vpop.f32.mrf.mxu1  ;;  %v1966_v47 = vmul.f32 %v1950_v32, %v1850_v56 }
  0xff   :  { %v1014_v48 = vadd.f32 %v1013_v36, %v1012_v26  ;;  %v790_v51 = vadd.f32 %v787_v41, %v786_v27  ;;  %v782_v52 = vrot.slane %v781_v33, 2  ;;  %v841_v53 = vrot.slane %v840_v34, 2 }
 0x100   :  { %v850_v54 = vadd.f32 %v847_v42, %v846_v30  ;;  %v937_v57 = vadd.f32 %v934_v43, %v933_v10  ;;  %v1968_v58 = vadd.f32 %v1021_v44, %v1020_v14  ;;  %v1970_v61 = vpop.f32.mrf.mxu0  ;;  %v1972_v62 = vpop.f32.mrf.mxu1  ;;  %v928_v1 = vrot.slane %v927_v35, 2 }
 0x101   :  { %2414 = vst [vmem:[#allocation14_spill] sm:$0xff] %v1970_v61  ;;  %v1015_v2 = vrot.slane %v1014_v48, 2  ;;  %v1094_v9 = vmul.f32 %v1882_v24, %v1970_v61  ;;  %v1108_v17 = vmul.f32 %v1950_v32, %v1970_v61  ;;  %v788_v18 = vmul.f32 %v1972_v62, %v1870_v12 }
 0x102   :  { %2413 = vst [vmem:[#allocation13_spill] sm:$0xff] %v1968_v58  ;;  %v848_v10 = vmul.f32 %v1972_v62, %v1856_v63  ;;  %v935_v14 = vmul.f32 %v1972_v62, %v1872_v15  ;;  %v1986_v21 = vmul.f32 %v1972_v62, %v1910_v49  ;;  %v1354_v22 = vpop.f32.mrf.mxu0  ;;  %v1429_v25 = vpop.f32.mrf.mxu1  ;;  %v1990_v26 = vmul.f32 %v1972_v62, %v1854_v60 }
 0x103   :  { %v1992_v27 = vadd.f32 %v1015_v2, %v1014_v48  ;;  %v1097_v30 = vadd.f32 %v1094_v9, %v1093_v39  ;;  %v1111_v36 = vadd.f32 %v1108_v17, %v1107_v40  ;;  %v791_v41 = vadd.f32 %v790_v51, %v788_v18 }
 0x104   :  { %2415 = vst [vmem:[#allocation15_spill] sm:$0xff] %v1986_v21  ;;  %2416 = vst [vmem:[#allocation16_spill] sm:$0xff] %v1990_v26  ;;  %v851_v42 = vadd.f32 %v850_v54, %v848_v10  ;;  %v938_v43 = vadd.f32 %v937_v57, %v935_v14  ;;  %v1994_v44 = vpop.f32.mrf.mxu0  ;;  %v1996_v45 = vpop.f32.mrf.mxu1  ;;  %v783_v46 = vadd.f32 %v782_v52, %v781_v33 }
 0x105   :  { %2417 = vst [vmem:[#allocation17_spill] sm:$0xff] %v1992_v27  ;;  %2418 = vst [vmem:[#allocation18_spill] sm:$0xff] %v1994_v44  ;;  %v842_v58 = vadd.f32 %v841_v53, %v840_v34  ;;  %v1095_v22 = vmul.f32 %v1900_v38, %v1994_v44  ;;  %v1109_v25 = vmul.f32 %v1972_v62, %v1994_v44 }
 0x106   :  { %v789_v48 = vmul.f32 %v1996_v45, %v1874_v16  ;;  %v849_v39 = vmul.f32 %v1996_v45, %v1860_v3  ;;  %v936_v40 = vmul.f32 %v1996_v45, %v1876_v19  ;;  %v2010_v51 = vmul.f32 %v1996_v45, %v1922_v5  ;;  %v1357_v33 = vpop.f32.mrf.mxu0  ;;  %v1432_v34 = vpop.f32.mrf.mxu1 }
 0x107   :  { %v2014_v52 = vmul.f32 %v1996_v45, %v1858_v0  ;;  %v784_v53 = vrot.slane %v783_v46, 1  ;;  %v1098_v54 = vadd.f32 %v1097_v30, %v1095_v22  ;;  %v1112_v57 = vadd.f32 %v1111_v36, %v1109_v25 }
 0x108   :  { %2419 = vst [vmem:[#allocation19_spill] sm:$0xff] %v2010_v51  ;;  %v792_v2 = vadd.f32 %v791_v41, %v789_v48  ;;  %v843_v9 = vrot.slane %v842_v58, 1  ;;  %v2016_v17 = vpop.f32.mrf.mxu0  ;;  %v2018_v18 = vpop.f32.mrf.mxu1  ;;  %v852_v14 = vadd.f32 %v851_v42, %v849_v39  ;;  %v2022_v44 = vadd.f32 %v928_v1, %v927_v35 }
 0x109   :  { %2420 = vst [vmem:[#allocation20_spill] sm:$0xff] %v2014_v52  ;;  %2421 = vst [vmem:[#allocation21_spill] sm:$0xff] %v2016_v17  ;;  %v2020_v10 = vadd.f32 %v784_v53, %v783_v46  ;;  %v2024_v33 = vadd.f32 %v938_v43, %v936_v40  ;;  %v1096_v34 = vmul.f32 %v1912_v50, %v2016_v17 }
 0x10a   :  { %v1110_v30 = vmul.f32 %v1996_v45, %v2016_v17  ;;  %v799_v36 = vmul.f32 %v2018_v18, %v1862_v4  ;;  %v861_v41 = vmul.f32 %v2018_v18, %v1848_v55  ;;  %v948_v46 = vmul.f32 %v2018_v18, %v1864_v7  ;;  %v1360_v42 = vpop.f32.mrf.mxu0  ;;  %v1435_v43 = vpop.f32.mrf.mxu1 }
 0x10b   :  { %2422 = vst [vmem:[#allocation22_spill] sm:$0xff] %v2020_v10  ;;  %v2038_v35 = vmul.f32 %v2018_v18, %v1880_v23  ;;  %v2042_v1 = vmul.f32 %v2018_v18, %v1948_v31  ;;  %v793_v22 = vrot.slane %v792_v2, 4  ;;  %v1099_v25 = vadd.f32 %v1098_v54, %v1096_v34 }
 0x10c   :  { %v1113_v48 = vadd.f32 %v1112_v57, %v1110_v30  ;;  %v2044_v39 = vadd.f32 %v843_v9, %v842_v58  ;;  %v853_v40 = vrot.slane %v852_v14, 4  ;;  %v2046_v53 = vpop.f32.mrf.mxu0  ;;  %v2048_v17 = vpop.f32.mrf.mxu1  ;;  %v930_v51 = vrot.slane %v2022_v44, 1 }
 0x10d   :  { %2423 = vst [vmem:[#allocation23_spill] sm:$0xff] %v2038_v35  ;;  %2424 = vst [vmem:[#allocation24_spill] sm:$0xff] %v2042_v1  ;;  %v794_v5 = vadd.f32 %v793_v22, %v792_v2  ;;  %v1100_v1 = vrot.slane %v1099_v25, 4  ;;  %v581_v54 = vmul.f32 %v1878_v20, %v2046_v53  ;;  %v598_v58 = vmul.f32 %v1924_v6, %v2046_v53 }
 0x10e   :  { %2425 = vst [vmem:[#allocation25_spill] sm:$0xff] %v2044_v39  ;;  %v1114_v42 = vrot.slane %v1113_v48, 4  ;;  %v615_v57 = vmul.f32 %v2018_v18, %v2046_v53  ;;  %v800_v2 = vmul.f32 %v2048_v17, %v1866_v8  ;;  %v862_v9 = vmul.f32 %v2048_v17, %v1852_v59  ;;  %v1363_v30 = vpop.f32.mrf.mxu0  ;;  %v1438_v43 = vpop.f32.mrf.mxu1 }
 0x10f   :  { %v949_v34 = vmul.f32 %v2048_v17, %v1868_v11  ;;  %v2065_v22 = vadd.f32 %v1100_v1, %v1099_v25  ;;  %v2071_v35 = vmul.f32 %v2048_v17, %v1898_v37  ;;  %v2075_v21 = vmul.f32 %v2048_v17, %v1970_v61 }
 0x110   :  { %v2067_v31 = vadd.f32 %v1114_v42, %v1113_v48  ;;  %v803_v27 = vadd.f32 %v800_v2, %v799_v36  ;;  %v865_v39 = vadd.f32 %v862_v9, %v861_v41  ;;  %v2079_v52 = vpop.f32.mrf.mxu0  ;;  %v2081_v30 = vpop.f32.mrf.mxu1  ;;  %v2085_v1 = vmul.f32 %v2048_v17, %v1850_v56 }
 0x111   :  { %2426 = vst [vmem:[#allocation26_spill] sm:$0xff] %v2065_v22  ;;  %2428 = vst [vmem:[#allocation28_spill] sm:$0xff] %v2071_v35  ;;  %v2077_v10 = vadd.f32 %v949_v34, %v948_v46  ;;  %v582_v42 = vmul.f32 %v1882_v24, %v2079_v52  ;;  %v599_v36 = vmul.f32 %v1950_v32, %v2079_v52  ;;  %v795_v29 = vrot.slane %v794_v5, 2 }
 0x112   :  { %2427 = vst [vmem:[#allocation27_spill] sm:$0xff] %v2067_v31  ;;  %2429 = vst [vmem:[#allocation29_spill] sm:$0xff] %v2075_v21  ;;  %v616_v41 = vmul.f32 %v2048_v17, %v2079_v52  ;;  %v801_v46 = vmul.f32 %v2081_v30, %v1870_v12  ;;  %v863_v2 = vmul.f32 %v2081_v30, %v1856_v63  ;;  %v1366_v34 = vpop.f32.mrf.mxu0  ;;  %v1441_v43 = vpop.f32.mrf.mxu1 }
 0x113   :  { %2430 = vst [vmem:[#allocation30_spill] sm:$0xff] %v2077_v10  ;;  %v2101_v9 = vmul.f32 %v2081_v30, %v1872_v15  ;;  %v585_v48 = vadd.f32 %v582_v42, %v581_v54  ;;  %v602_v25 = vadd.f32 %v599_v36, %v598_v58  ;;  %v2105_v61 = vmul.f32 %v2081_v30, %v1910_v49 }
 0x114   :  { %v2109_v21 = vmul.f32 %v2081_v30, %v1854_v60  ;;  %v619_v31 = vadd.f32 %v616_v41, %v615_v57  ;;  %v804_v22 = vadd.f32 %v803_v27, %v801_v46  ;;  %v2111_v35 = vpop.f32.mrf.mxu0  ;;  %v2113_v10 = vpop.f32.mrf.mxu1  ;;  %v796_v46 = vadd.f32 %v795_v29, %v794_v5 }
 0x115   :  { %2431 = vst [vmem:[#allocation31_spill] sm:$0xff] %v2101_v9  ;;  %2432 = vst [vmem:[#allocation32_spill] sm:$0xff] %v2105_v61  ;;  %v854_v9 = vadd.f32 %v853_v40, %v852_v14  ;;  %v583_v54 = vmul.f32 %v1900_v38, %v2111_v35  ;;  %v600_v58 = vmul.f32 %v1972_v62, %v2111_v35 }
 0x116   :  { %2433 = vst [vmem:[#allocation33_spill] sm:$0xff] %v2109_v21  ;;  %v617_v42 = vmul.f32 %v2081_v30, %v2111_v35  ;;  %v802_v36 = vmul.f32 %v2113_v10, %v1874_v16  ;;  %v864_v27 = vmul.f32 %v2113_v10, %v1860_v3  ;;  %v2127_v57 = vmul.f32 %v2113_v10, %v1876_v19  ;;  %v1369_v14 = vpop.f32.mrf.mxu0  ;;  %v1444_v40 = vpop.f32.mrf.mxu1 }
 0x117   :  { %v2131_v41 = vmul.f32 %v2113_v10, %v1858_v0  ;;  %v586_v34 = vadd.f32 %v585_v48, %v583_v54  ;;  %v603_v43 = vadd.f32 %v602_v25, %v600_v58  ;;  %v797_v3 = vrot.slane %v796_v46, 1 }
 0x118   :  { %2434 = vst [vmem:[#allocation34_spill] sm:$0xff] %v2127_v57  ;;  %v620_v61 = vadd.f32 %v619_v31, %v617_v42  ;;  %v2133_v49 = vadd.f32 %v804_v22, %v802_v36  ;;  %v2135_v21 = vpop.f32.mrf.mxu0  ;;  %v2137_v26 = vpop.f32.mrf.mxu1  ;;  %v855_v28 = vrot.slane %v854_v9, 2  ;;  %v866_v19 = vadd.f32 %v865_v39, %v863_v2 }
 0x119   :  { %v2140_v14 = vadd.f32 %v930_v51, %v2022_v44  ;;  %v584_v40 = vmul.f32 %v1912_v50, %v2135_v21  ;;  %v601_v5 = vmul.f32 %v1996_v45, %v2135_v21  ;;  %v618_v29 = vmul.f32 %v2113_v10, %v2135_v21 }
 0x11a   :  { %v632_v31 = vmul.f32 %v2137_v26, %v2046_v53  ;;  %v812_v22 = vmul.f32 %v2137_v26, %v1862_v4  ;;  %v2154_v39 = vmul.f32 %v2137_v26, %v1848_v55  ;;  %v2158_v44 = vmul.f32 %v2137_v26, %v1864_v7  ;;  %v1372_v25 = vpop.f32.mrf.mxu0  ;;  %v1447_v48 = vpop.f32.mrf.mxu1 }
 0x11b   :  { %2435 = vst [vmem:[#allocation35_spill] sm:$0xff] %v2140_v14  ;;  %v2162_v51 = vmul.f32 %v2137_v26, %v1880_v23  ;;  %v587_v2 = vadd.f32 %v586_v34, %v584_v40  ;;  %v604_v54 = vadd.f32 %v603_v43, %v601_v5  ;;  %v621_v53 = vadd.f32 %v620_v61, %v618_v29 }
 0x11c   :  { %2436 = vst [vmem:[#allocation36_spill] sm:$0xff] %v2158_v44  ;;  %v2164_v58 = vadd.f32 %v797_v3, %v796_v46  ;;  %v380_v4 = vpop.f32.mrf.mxu0  ;;  %v2166_v42 = vpop.f32.mrf.mxu1  ;;  %v2169_v36 = vadd.f32 %v855_v28, %v854_v9  ;;  %v2171_v7 = vadd.f32 %v866_v19, %v864_v27  ;;  %v2438_v23 = vrot.slane %v2024_v33, 4 }
 0x11d   :  { %2437 = vst [vmem:[#allocation37_spill] sm:$0xff] %v2162_v51  ;;  %v588_v25 = vrot.slane %v587_v2, 4  ;;  %v605_v34 = vrot.slane %v604_v54, 4  ;;  %v622_v43 = vrot.slane %v621_v53, 4  ;;  %v655_v3 = vmul.f32 %v1878_v20, %v380_v4 }
 0x11e   :  { %v2176_v51 = vadd.f32 %v2438_v23, %v2024_v33  ;;  %v668_v61 = vmul.f32 %v1924_v6, %v380_v4  ;;  %v681_v46 = vmul.f32 %v2018_v18, %v380_v4  ;;  %v694_v40 = vmul.f32 %v2137_v26, %v380_v4  ;;  %v1375_v28 = vpop.f32.mrf.mxu0  ;;  %v1450_v9 = vpop.f32.mrf.mxu1 }
 0x11f   :  { %v633_v19 = vmul.f32 %v2166_v42, %v2079_v52  ;;  %v589_v27 = vadd.f32 %v588_v25, %v587_v2  ;;  %v606_v5 = vadd.f32 %v605_v34, %v604_v54  ;;  %v623_v33 = vadd.f32 %v622_v43, %v621_v53 }
 0x120   :  { %2439 = vst [vmem:[#allocation38_spill] sm:$0xff] %v2176_v51  ;;  %v813_v29 = vmul.f32 %v2166_v42, %v1866_v8  ;;  %v2188_v23 = vmul.f32 %v2166_v42, %v1852_v59  ;;  %v2192_v55 = vmul.f32 %v2166_v42, %v1868_v11  ;;  %v2196_v52 = vmul.f32 %v2166_v42, %v1898_v37  ;;  %v385_v4 = vpop.f32.mrf.mxu0  ;;  %v2198_v2 = vpop.f32.mrf.mxu1 }
 0x121   :  { %v636_v48 = vadd.f32 %v633_v19, %v632_v31  ;;  %v590_v54 = vrot.slane %v589_v27, 2  ;;  %v607_v53 = vrot.slane %v606_v5, 2  ;;  %v624_v25 = vrot.slane %v623_v33, 2 }
 0x122   :  { %2440 = vst [vmem:[#allocation39_spill] sm:$0xff] %v2192_v55  ;;  %2441 = vst [vmem:[#allocation40_spill] sm:$0xff] %v2196_v52  ;;  %v2200_v8 = vadd.f32 %v813_v29, %v812_v22  ;;  %v656_v31 = vmul.f32 %v1882_v24, %v385_v4  ;;  %v669_v59 = vmul.f32 %v1950_v32, %v385_v4  ;;  %v1378_v43 = vpop.f32.mrf.mxu0  ;;  %v1453_v19 = vpop.f32.mrf.mxu1 }
 0x123   :  { %v682_v34 = vmul.f32 %v2048_v17, %v385_v4  ;;  %v695_v11 = vmul.f32 %v2166_v42, %v385_v4  ;;  %v591_v37 = vadd.f32 %v590_v54, %v589_v27  ;;  %v608_v28 = vadd.f32 %v607_v53, %v606_v5 }
 0x124   :  { %v625_v9 = vadd.f32 %v624_v25, %v623_v33  ;;  %v634_v52 = vmul.f32 %v2198_v2, %v2111_v35  ;;  %v659_v57 = vadd.f32 %v656_v31, %v655_v3  ;;  %v672_v55 = vadd.f32 %v669_v59, %v668_v61  ;;  %v390_v44 = vpop.f32.mrf.mxu0  ;;  %v2208_v24 = vpop.f32.mrf.mxu1 }
 0x125   :  { %v685_v22 = vadd.f32 %v682_v34, %v681_v46  ;;  %v698_v29 = vadd.f32 %v695_v11, %v694_v40  ;;  %v592_v32 = vrot.slane %v591_v37, 1  ;;  %v609_v51 = vrot.slane %v608_v28, 1 }
 0x126   :  { %v626_v17 = vrot.slane %v625_v9, 1  ;;  %v637_v14 = vadd.f32 %v636_v48, %v634_v52  ;;  %v2212_v4 = vmul.f32 %v2198_v2, %v1870_v12  ;;  %v2216_v27 = vmul.f32 %v2198_v2, %v1856_v63  ;;  %v1381_v61 = vpop.f32.mrf.mxu0  ;;  %v1456_v46 = vpop.f32.mrf.mxu1 }
 0x127   :  { %v2220_v35 = vmul.f32 %v2198_v2, %v1872_v15  ;;  %v657_v3 = vmul.f32 %v1900_v38, %v390_v44  ;;  %v2223_v40 = vadd.f32 %v592_v32, %v591_v37  ;;  %v2225_v5 = vadd.f32 %v609_v51, %v608_v28 }
 0x128   :  { %v2227_v33 = vadd.f32 %v626_v17, %v625_v9  ;;  %v670_v12 = vmul.f32 %v1972_v62, %v390_v44  ;;  %v683_v63 = vmul.f32 %v2081_v30, %v390_v44  ;;  %v696_v52 = vmul.f32 %v2198_v2, %v390_v44  ;;  %v395_v54 = vpop.f32.mrf.mxu0  ;;  %v520_v38 = vpop.f32.mrf.mxu1 }
 0x129   :  { %v660_v48 = vadd.f32 %v659_v57, %v657_v3  ;;  %v635_v15 = vmul.f32 %v2208_v24, %v2135_v21  ;;  %v2236_v25 = vmul.f32 %v2208_v24, %v1874_v16  ;;  %v658_v51 = vmul.f32 %v1912_v50, %v395_v54  ;;  %572 = vst [vmem:[#allocation2 + $0x158] sm:$0xff] %v520_v38  ;;  %v2442_v38 = vld [vmem:[#allocation10_spill] sm:$0xff] }
 0x12a   :  { %v673_v53 = vadd.f32 %v672_v55, %v670_v12  ;;  %v671_v31 = vmul.f32 %v1996_v45, %v395_v54  ;;  %v686_v62 = vadd.f32 %v685_v22, %v683_v63  ;;  %v699_v57 = vadd.f32 %v698_v29, %v696_v52  ;;  %v1384_v34 = vpop.f32.mrf.mxu0  ;;  %v1459_v21 = vpop.f32.mrf.mxu1 }
 0x12b   :  { %v2240_v59 = vadd.f32 %v637_v14, %v635_v15  ;;  %v684_v44 = vmul.f32 %v2113_v10, %v395_v54  ;;  %v661_v11 = vadd.f32 %v660_v48, %v658_v51  ;;  %v697_v55 = vmul.f32 %v2208_v24, %v395_v54  ;;  %v2443_v51 = vld [vmem:[#allocation16_spill] sm:$0xff] }
 0x12c   :  { %v674_v43 = vadd.f32 %v673_v53, %v671_v31  ;;  %v754_v16 = vmul.f32 %v2166_v42, %v1850_v56  ;;  %v400_v50 = vpop.f32.mrf.mxu0  ;;  %v755_v45 = vmul.f32 %v2198_v2, %v1854_v60  ;;  %v756_v14 = vmul.f32 %v2208_v24, %v1858_v0 }
 0x12d   :  { %v687_v19 = vadd.f32 %v686_v62, %v684_v44  ;;  %v639_v37 = vrot.slane %v2240_v59, 4  ;;  %v662_v28 = vrot.slane %v661_v11, 4  ;;  %v700_v22 = vadd.f32 %v699_v57, %v697_v55  ;;  %v2444_v62 = vld [vmem:[#allocation33_spill] sm:$0xff] }
 0x12e   :  { %v675_v9 = vrot.slane %v674_v43, 4  ;;  %v714_v29 = vmul.f32 %v1878_v20, %v400_v50  ;;  %v727_v17 = vmul.f32 %v1924_v6, %v400_v50  ;;  %v740_v56 = vmul.f32 %v2018_v18, %v400_v50  ;;  %v1387_v61 = vpop.f32.mrf.mxu0 }
 0x12f   :  { %v688_v32 = vrot.slane %v687_v19, 4  ;;  %v753_v3 = vmul.f32 %v2137_v26, %v400_v50  ;;  %v663_v46 = vadd.f32 %v662_v28, %v661_v11  ;;  %v701_v12 = vrot.slane %v700_v22, 4 }
 0x130   :  { %v676_v60 = vadd.f32 %v675_v9, %v674_v43  ;;  %v718_v0 = vadd.f32 %v1932_v13, %v714_v29  ;;  %v731_v63 = vadd.f32 %v1966_v47, %v727_v17  ;;  %v744_v52 = vadd.f32 %v2085_v1, %v740_v56  ;;  %v2445_v47 = vld [vmem:[#allocation11_spill] sm:$0xff]  ;;  %v2446_v43 = vld [vmem:[#allocation20_spill] sm:$0xff] }
 0x131   :  { %v689_v48 = vadd.f32 %v688_v32, %v687_v19  ;;  %v757_v15 = vadd.f32 %v754_v16, %v753_v3  ;;  %v664_v20 = vrot.slane %v663_v46, 2  ;;  %v702_v6 = vadd.f32 %v701_v12, %v700_v22 }
 0x132   :  { %v677_v54 = vrot.slane %v676_v60, 2  ;;  %v719_v18 = vadd.f32 %v718_v0, %v2442_v38  ;;  %v732_v31 = vadd.f32 %v731_v63, %v2443_v51  ;;  %v745_v57 = vadd.f32 %v744_v52, %v2444_v62 }
 0x133   :  { %v690_v53 = vrot.slane %v689_v48, 2  ;;  %v758_v44 = vadd.f32 %v757_v15, %v755_v45  ;;  %v665_v13 = vadd.f32 %v664_v20, %v663_v46  ;;  %v703_v21 = vrot.slane %v702_v6, 2 }
 0x134   :  { %v678_v34 = vadd.f32 %v677_v54, %v676_v60  ;;  %v720_v11 = vadd.f32 %v719_v18, %v2445_v47  ;;  %v733_v55 = vadd.f32 %v732_v31, %v2446_v43  ;;  %v746_v16 = vadd.f32 %v745_v57, %v2131_v41  ;;  %v2448_v43 = vld [vmem:[#allocation22_spill] sm:$0xff] }
 0x135   :  { %v691_v1 = vadd.f32 %v690_v53, %v689_v48  ;;  %v759_v19 = vadd.f32 %v758_v44, %v756_v14  ;;  %v666_v50 = vrot.slane %v665_v13, 1  ;;  %v704_v9 = vadd.f32 %v703_v21, %v702_v6 }
 0x136   :  { %v679_v28 = vrot.slane %v678_v34, 1  ;;  %v721_v22 = vrot.slane %v720_v11, 4  ;;  %v734_v32 = vrot.slane %v733_v55, 4  ;;  %v747_v17 = vrot.slane %v746_v16, 4 }
 0x137   :  { %v692_v29 = vrot.slane %v691_v1, 1  ;;  %v760_v45 = vrot.slane %v759_v19, 4  ;;  %v667_v56 = vadd.f32 %v666_v50, %v665_v13  ;;  %v705_v61 = vrot.slane %v704_v9, 1 }
 0x138   :  { %v680_v3 = vadd.f32 %v679_v28, %v678_v34  ;;  %v722_v46 = vadd.f32 %v721_v22, %v720_v11  ;;  %v735_v12 = vadd.f32 %v734_v32, %v733_v55  ;;  %v748_v0 = vadd.f32 %v747_v17, %v746_v16  ;;  %v2449_v17 = vld [vmem:[#allocation6_spill] sm:$0xff] }
 0x139   :  { %v693_v60 = vadd.f32 %v692_v29, %v691_v1  ;;  %v761_v48 = vadd.f32 %v760_v45, %v759_v19  ;;  %v706_v63 = vadd.f32 %v705_v61, %v704_v9  ;;  %v640_v14 = vadd.f32 %v639_v37, %v2240_v59 }
 0x13a   :  { %v723_v41 = vrot.slane %v722_v46, 2  ;;  %v646_v52 = vsel %vm645_vm2, %v2223_v40, %v2225_v5  ;;  %v736_v15 = vrot.slane %v735_v12, 2  ;;  %v749_v20 = vrot.slane %v748_v0, 2 }
 0x13b   :  { %v762_v54 = vrot.slane %v761_v48, 2  ;;  %v648_v6 = vsel %vm647_vm3, %v646_v52, %v2227_v33  ;;  %v641_v18 = vrot.slane %v640_v14, 2  ;;  %v707_v53 = vsel %vm645_vm2, %v667_v56, %v680_v3 }
 0x13c   :  { %v724_v38 = vadd.f32 %v723_v41, %v722_v46  ;;  %v2447_v51 = vrot.slane %v2133_v49, 4  ;;  %v737_v62 = vadd.f32 %v736_v15, %v735_v12  ;;  %v750_v59 = vadd.f32 %v749_v20, %v748_v0  ;;  %v2450_v12 = vld [vmem:[#allocation25_spill] sm:$0xff]  ;;  %v2451_v41 = vld [vmem:[#allocation35_spill] sm:$0xff]  ;;  %v2452_v15 = vld [vmem:[#allocation38_spill] sm:$0xff] }
 0x13d   :  { %v708_v37 = vsel %vm647_vm3, %v707_v53, %v693_v60  ;;  %v763_v57 = vadd.f32 %v762_v54, %v761_v48  ;;  %v642_v5 = vadd.f32 %v641_v18, %v640_v14  ;;  %v817_v47 = vadd.f32 %v2200_v8, %v2212_v4  ;;  %v2453_v54 = vld [vmem:[#allocation31_spill] sm:$0xff] }
 0x13e   :  { %v807_v31 = vadd.f32 %v2447_v51, %v2133_v49  ;;  %v725_v40 = vrot.slane %v724_v38, 1  ;;  %v2276_v44 = vsel %vm649_vm4, %v708_v37, %v706_v63  ;;  %v738_v33 = vrot.slane %v737_v62, 1  ;;  %v2455_v51 = vld [vmem:[#allocation7_spill] sm:$0xff] }
 0x13f   :  { %v751_v34 = vrot.slane %v750_v59, 1  ;;  %v764_v21 = vrot.slane %v763_v57, 1  ;;  %v643_v11 = vrot.slane %v642_v5, 1  ;;  %v825_v55 = vsel %vm645_vm2, %v2448_v43, %v2164_v58 }
 0x140   :  { %v808_v13 = vrot.slane %v807_v31, 2  ;;  %v726_v1 = vadd.f32 %v725_v40, %v724_v38  ;;  %v739_v16 = vadd.f32 %v738_v33, %v737_v62  ;;  %v818_v28 = vadd.f32 %v817_v47, %v2236_v25  ;;  %v2457_v62 = vld [vmem:[#allocation39_spill] sm:$0xff]  ;;  %v2458_v40 = vld [vmem:[#allocation34_spill] sm:$0xff] }
 0x141   :  { %v752_v19 = vadd.f32 %v751_v34, %v750_v59  ;;  %v765_v50 = vadd.f32 %v764_v21, %v763_v57  ;;  %v644_v9 = vadd.f32 %v643_v11, %v642_v5  ;;  %v857_v29 = vrot.slane %v2169_v36, 1  ;;  %v2459_v34 = vld [vmem:[#allocation17_spill] sm:$0xff]  ;;  %v2461_v11 = vld [vmem:[#allocation15_spill] sm:$0xff] }
 0x142   :  { %v809_v49 = vadd.f32 %v808_v13, %v807_v31  ;;  %v868_v32 = vrot.slane %v2171_v7, 4  ;;  %v766_v8 = vsel %vm645_vm2, %v726_v1, %v739_v16  ;;  %v819_v4 = vrot.slane %v818_v28, 4  ;;  %v2456_v31 = vld [vmem:[#allocation36_spill] sm:$0xff]  ;;  %v2462_v1 = vld [vmem:[#allocation13_spill] sm:$0xff] }
 0x143   :  { %v879_v45 = vmul.f32 %v2208_v24, %v2449_v17  ;;  %v880_v58 = vadd.f32 %v2188_v23, %v2154_v39  ;;  %v2292_v56 = vsel %vm649_vm4, %v648_v6, %v644_v9  ;;  %v767_v25 = vsel %vm647_vm3, %v766_v8, %v752_v19  ;;  %v2454_v6 = vld [vmem:[#allocation30_spill] sm:$0xff] }
 0x144   :  { %v810_v22 = vrot.slane %v809_v49, 1  ;;  %v858_v61 = vadd.f32 %v857_v29, %v2169_v36  ;;  %v2297_v46 = vsel %vm649_vm4, %v767_v25, %v765_v50  ;;  %v820_v60 = vadd.f32 %v819_v4, %v818_v28  ;;  %v2464_v25 = vld [vmem:[#allocation9_spill] sm:$0xff] }
 0x145   :  { %v845_v0 = vmul.f32 %v2450_v12, %v2292_v56  ;;  %v869_v48 = vadd.f32 %v868_v32, %v2171_v7  ;;  %v881_v23 = vadd.f32 %v880_v58, %v2216_v27  ;;  %v932_v14 = vmul.f32 %v2451_v41, %v2292_v56  ;;  %v2465_v41 = vld [vmem:[#allocation23_spill] sm:$0xff] }
 0x146   :  { %v811_v3 = vadd.f32 %v810_v22, %v809_v49  ;;  %v859_v39 = vmul.f32 %v858_v61, %v2276_v44  ;;  %v821_v52 = vrot.slane %v820_v60, 2  ;;  %v942_v20 = vrot.slane %v2452_v15, 2  ;;  %v2463_v22 = vld [vmem:[#allocation19_spill] sm:$0xff] }
 0x147   :  { %v870_v36 = vrot.slane %v869_v48, 2  ;;  %v953_v38 = vadd.f32 %v2454_v6, %v2453_v54  ;;  %v882_v53 = vadd.f32 %v881_v23, %v879_v45  ;;  %v966_v7 = vmul.f32 %v2208_v24, %v2455_v51  ;;  %v2467_v6 = vld [vmem:[#allocation8_spill] sm:$0xff] }
 0x148   :  { %v826_v63 = vsel %vm647_vm3, %v825_v55, %v811_v3  ;;  %v860_v18 = vadd.f32 %v859_v39, %v845_v0  ;;  %v967_v59 = vadd.f32 %v2457_v62, %v2456_v31  ;;  %v822_v37 = vadd.f32 %v821_v52, %v820_v60  ;;  %v2466_v52 = vld [vmem:[#allocation28_spill] sm:$0xff] }
 0x149   :  { %v871_v27 = vadd.f32 %v870_v36, %v869_v48  ;;  %v943_v57 = vadd.f32 %v942_v20, %v2452_v15  ;;  %v954_v5 = vadd.f32 %v953_v38, %v2458_v40  ;;  %v883_v13 = vrot.slane %v882_v53, 4  ;;  %v2471_v40 = vld [vmem:[#allocation26_spill] sm:$0xff] }
 0x14a   :  { %v968_v33 = vadd.f32 %v967_v59, %v2220_v35  ;;  %v2460_v21 = vrot.slane %v2459_v34, 1  ;;  %v1025_v49 = vadd.f32 %v2462_v1, %v2461_v11  ;;  %v823_v43 = vrot.slane %v822_v37, 1  ;;  %v2473_v1 = vld [vmem:[#allocation27_spill] sm:$0xff] }
 0x14b   :  { %v872_v55 = vrot.slane %v871_v27, 1  ;;  %v944_v16 = vrot.slane %v943_v57, 1  ;;  %v955_v19 = vrot.slane %v954_v5, 4  ;;  %v884_v50 = vadd.f32 %v883_v13, %v882_v53 }
 0x14c   :  { %v1018_v47 = vadd.f32 %v2460_v21, %v2459_v34  ;;  %v969_v28 = vadd.f32 %v968_v33, %v966_v7  ;;  %v1026_v29 = vadd.f32 %v1025_v49, %v2463_v22  ;;  %v824_v32 = vadd.f32 %v823_v43, %v822_v37  ;;  %v2468_v7 = vld [vmem:[#allocation32_spill] sm:$0xff]  ;;  %v2469_v37 = vld [vmem:[#allocation37_spill] sm:$0xff] }
 0x14d   :  { %v873_v35 = vadd.f32 %v872_v55, %v871_v27  ;;  %v945_v8 = vadd.f32 %v944_v16, %v943_v57  ;;  %v956_v4 = vadd.f32 %v955_v19, %v954_v5  ;;  %v885_v17 = vrot.slane %v884_v50, 2  ;;  %v2470_v27 = vld [vmem:[#allocation40_spill] sm:$0xff] }
 0x14e   :  { %v2323_v9 = vmul.f32 %v1018_v47, %v2292_v56  ;;  %v970_v45 = vrot.slane %v969_v28, 4  ;;  %v1027_v58 = vrot.slane %v1026_v29, 4  ;;  %v1038_v3 = vmul.f32 %v2113_v10, %v2464_v25 }
 0x14f   :  { %v2329_v61 = vsel %vm649_vm4, %v826_v63, %v824_v32  ;;  %v874_v60 = vmul.f32 %v873_v35, %v2297_v46  ;;  %v946_v12 = vmul.f32 %v945_v8, %v2276_v44  ;;  %v957_v0 = vrot.slane %v956_v4, 2 }
 0x150   :  { %v886_v48 = vadd.f32 %v885_v17, %v884_v50  ;;  %v971_v39 = vadd.f32 %v970_v45, %v969_v28  ;;  %v1028_v23 = vadd.f32 %v1027_v58, %v1026_v29  ;;  %v1039_v36 = vadd.f32 %v2466_v52, %v2465_v41  ;;  %v2475_v41 = vld [vmem:[#allocation18_spill] sm:$0xff] }
 0x151   :  { %v875_v15 = vadd.f32 %v874_v60, %v860_v18  ;;  %v947_v20 = vadd.f32 %v946_v12, %v932_v14  ;;  %v958_v54 = vadd.f32 %v957_v0, %v956_v4  ;;  %v1052_v38 = vmul.f32 %v2198_v2, %v2467_v6 }
 0x152   :  { %v887_v63 = vrot.slane %v886_v48, 1  ;;  %v972_v53 = vrot.slane %v971_v39, 2  ;;  %v1029_v51 = vrot.slane %v1028_v23, 2  ;;  %v1040_v31 = vadd.f32 %v1039_v36, %v2468_v7  ;;  %v2476_v36 = vld [vmem:[#allocation21_spill] sm:$0xff] }
 0x153   :  { %v959_v62 = vrot.slane %v958_v54, 1  ;;  %v1053_v59 = vmul.f32 %v2208_v24, %v2464_v25  ;;  %v1054_v57 = vadd.f32 %v2470_v27, %v2469_v37  ;;  %v2472_v18 = vrot.slane %v2471_v40, 2  ;;  %v2478_v7 = vld [vmem:[#allocation29_spill] sm:$0xff]  ;;  %v2480_v37 = vld [vmem:[#allocation14_spill] sm:$0xff] }
 0x154   :  { %v888_v5 = vadd.f32 %v887_v63, %v886_v48  ;;  %v973_v13 = vadd.f32 %v972_v53, %v971_v39  ;;  %v1030_v33 = vadd.f32 %v1029_v51, %v1028_v23  ;;  %v1041_v34 = vadd.f32 %v1040_v31, %v1038_v3  ;;  %v2477_v51 = vld [vmem:[#allocation24_spill] sm:$0xff] }
 0x155   :  { %v1103_v14 = vadd.f32 %v2472_v18, %v2471_v40  ;;  %v960_v21 = vadd.f32 %v959_v62, %v958_v54  ;;  %v1055_v47 = vadd.f32 %v1054_v57, %v1052_v38  ;;  %v2474_v49 = vrot.slane %v2473_v1, 2 }
 0x156   :  { %v889_v55 = vmul.f32 %v888_v5, %v2329_v61  ;;  %v974_v16 = vrot.slane %v973_v13, 1  ;;  %v1031_v19 = vrot.slane %v1030_v33, 1  ;;  %v1042_v50 = vrot.slane %v1041_v34, 4 }
 0x157   :  { %v1104_v11 = vrot.slane %v1103_v14, 1  ;;  %v1117_v43 = vadd.f32 %v2474_v49, %v2473_v1  ;;  %v961_v28 = vmul.f32 %v960_v21, %v2297_v46  ;;  %v1056_v22 = vadd.f32 %v1055_v47, %v1053_v59  ;;  %v2479_v59 = vld [vmem:[#allocation12_spill] sm:$0xff] }
 0x158   :  { %v890_v35 = vadd.f32 %v889_v55, %v875_v15  ;;  %v975_v8 = vadd.f32 %v974_v16, %v973_v13  ;;  %v1032_v4 = vadd.f32 %v1031_v19, %v1030_v33  ;;  %v1043_v17 = vadd.f32 %v1042_v50, %v1041_v34 }
 0x159   :  { %v1105_v29 = vadd.f32 %v1104_v11, %v1103_v14  ;;  %v1118_v32 = vrot.slane %v1117_v43, 1  ;;  %v962_v45 = vadd.f32 %v961_v28, %v947_v20  ;;  %v1057_v58 = vrot.slane %v1056_v22, 4 }
 0x15a   :  { %v891_v60 = vmul.f32 0.17677669, %v890_v35  ;;  %v976_v12 = vmul.f32 %v975_v8, %v2329_v61  ;;  %v1033_v0 = vmul.f32 %v1032_v4, %v2276_v44  ;;  %v1044_v48 = vrot.slane %v1043_v17, 2 }
 0x15b   :  { %v1106_v25 = vmul.f32 %v1105_v29, %v2292_v56  ;;  %v1119_v3 = vadd.f32 %v1118_v32, %v1117_v43  ;;  %v1058_v39 = vadd.f32 %v1057_v58, %v1056_v22  ;;  %v1124_v52 = vmul.f32 %v2081_v30, %v2475_v41 }
 0x15c   :  { %v1125_v15 = vmul.f32 %v2113_v10, %v2476_v36  ;;  %v893_v20 = vsel %vm892_vm5, %v891_v60, -inf  ;;  %v977_v54 = vadd.f32 %v976_v12, %v962_v45  ;;  %v1034_v56 = vadd.f32 %v1033_v0, %v2323_v9 }
 0x15d   :  { %v1120_v23 = vmul.f32 %v1119_v3, %v2276_v44  ;;  %v1045_v6 = vadd.f32 %v1044_v48, %v1043_v17  ;;  %v894_v38 = vrot.slane %v893_v20, 4  ;;  %v1059_v63 = vrot.slane %v1058_v39, 2 }
 0x15e   :  { %v1126_v31 = vadd.f32 %v2478_v7, %v2477_v51  ;;  %v978_v62 = vmul.f32 0.17677669, %v977_v54  ;;  %v1137_v30 = vmul.f32 %v2137_v26, %v2479_v59  ;;  %v1138_v10 = vmul.f32 %v2166_v42, %v2480_v37 }
 0x15f   :  { %v1121_v53 = vadd.f32 %v1120_v23, %v1106_v25  ;;  %v1046_v44 = vrot.slane %v1045_v6, 1  ;;  %v895_v27 = vmax.f32 %v893_v20, %v894_v38  ;;  %v1060_v57 = vadd.f32 %v1059_v63, %v1058_v39 }
 0x160   :  { %v1127_v40 = vadd.f32 %v1126_v31, %v1124_v52  ;;  %v1139_v9 = vmul.f32 %v2198_v2, %v2475_v41  ;;  %v979_v18 = vsel %vm892_vm5, %v978_v62, -inf  ;;  %v1140_v5 = vmul.f32 %v2208_v24, %v2476_v36 }
 0x161   :  { %v1047_v14 = vadd.f32 %v1046_v44, %v1045_v6  ;;  %v1141_v13 = vadd.f32 %v1138_v10, %v1137_v30  ;;  %v896_v33 = vrot.slane %v895_v27, 2  ;;  %v980_v34 = vrot.slane %v979_v18, 4 }
 0x162   :  { %v1061_v21 = vrot.slane %v1060_v57, 1  ;;  %v1128_v26 = vadd.f32 %v1127_v40, %v1125_v15 }
 0x163   :  { %v1048_v47 = vmul.f32 %v1047_v14, %v2297_v46  ;;  %v1142_v42 = vadd.f32 %v1141_v13, %v1139_v9  ;;  %v897_v11 = vmax.f32 %v895_v27, %v896_v33  ;;  %v981_v1 = vmax.f32 %v979_v18, %v980_v34 }
 0x164   :  { %v1062_v49 = vadd.f32 %v1061_v21, %v1060_v57  ;;  %v1129_v43 = vrot.slane %v1128_v26, 4 }
 0x165   :  { %v1049_v55 = vadd.f32 %v1048_v47, %v1034_v56  ;;  %v1143_v2 = vadd.f32 %v1142_v42, %v1140_v5  ;;  %v898_v16 = vrot.slane %v897_v11, 1  ;;  %v982_v19 = vrot.slane %v981_v1, 2 }
 0x166   :  { %v1063_v50 = vmul.f32 %v1062_v49, %v2329_v61  ;;  %v1130_v28 = vadd.f32 %v1129_v43, %v1128_v26 }
 0x167   :  { %v1144_v24 = vrot.slane %v1143_v2, 4  ;;  %v899_v22 = vmax.f32 %v897_v11, %v898_v16  ;;  %v983_v29 = vmax.f32 %v981_v1, %v982_v19 }
 0x168   :  { %v1064_v32 = vadd.f32 %v1063_v50, %v1049_v55  ;;  %v1131_v35 = vrot.slane %v1130_v28, 2 }
 0x169   :  { %v1145_v8 = vadd.f32 %v1144_v24, %v1143_v2  ;;  %v900_v4 = vsub.f32 %v891_v60, %v899_v22  ;;  %v984_v17 = vrot.slane %v983_v29, 1 }
 0x16a   :  { %v1065_v45 = vmul.f32 0.17677669, %v1064_v32  ;;  %v1132_v58 = vadd.f32 %v1131_v35, %v1130_v28 }
 0x16b   :  { %v1146_v25 = vrot.slane %v1145_v8, 2  ;;  %v901_v3 = vmul.f32 1.442695, %v900_v4  ;;  %v985_v12 = vmax.f32 %v983_v29, %v984_v17 }
 0x16c   :  { %v1066_v0 = vsel %vm892_vm5, %v1065_v45, -inf  ;;  %v1133_v48 = vrot.slane %v1132_v58, 1 }
 0x16d   :  { %v1067_v39 = vrot.slane %v1066_v0, 4  ;;  %v1147_v23 = vadd.f32 %v1146_v25, %v1145_v8  ;;  %1473 = vpow2.f32 %v901_v3  ;;  %v986_v41 = vsub.f32 %v978_v62, %v985_v12 }
 0x16e   :  { %v1134_v52 = vadd.f32 %v1133_v48, %v1132_v58 }
 0x16f   :  { %v1068_v36 = vmax.f32 %v1066_v0, %v1067_v39  ;;  %v1148_v15 = vrot.slane %v1147_v23, 1  ;;  %v987_v20 = vmul.f32 1.442695, %v986_v41 }
 0x170   :  { %v1135_v54 = vmul.f32 %v1134_v52, %v2297_v46 }
 0x171   :  { %v1069_v60 = vrot.slane %v1068_v36, 2  ;;  %v1149_v56 = vadd.f32 %v1148_v15, %v1147_v23  ;;  %1475 = vpow2.f32 %v987_v20 }
 0x172   :  { %v1136_v6 = vadd.f32 %v1135_v54, %v1121_v53 }
 0x173   :  { %v1070_v38 = vmax.f32 %v1068_v36, %v1069_v60  ;;  %v1150_v63 = vmul.f32 %v1149_v56, %v2329_v61 }
 0x175   :  { %v1071_v51 = vrot.slane %v1070_v38, 1  ;;  %v1151_v7 = vadd.f32 %v1150_v63, %v1136_v6 }
 0x177   :  { %v1072_v31 = vmax.f32 %v1070_v38, %v1071_v51  ;;  %v1152_v44 = vmul.f32 0.17677669, %v1151_v7 }
 0x179   :  { %v1073_v59 = vsub.f32 %v1065_v45, %v1072_v31  ;;  %v1153_v62 = vsel %vm892_vm5, %v1152_v44, -inf }
 0x17a   :  { %v1154_v30 = vrot.slane %v1153_v62, 4  ;;  %v1474_v37 = vpop.eup %1473 }
 0x17b   :  { %v1074_v10 = vmul.f32 1.442695, %v1073_v59  ;;  %v903_v27 = vsel %vm892_vm5, %v1474_v37, 0.0 }
 0x17c   :  { %v1155_v46 = vmax.f32 %v1153_v62, %v1154_v30  ;;  %v904_v57 = vrot.slane %v903_v27, 4  ;;  %v1176_v62 = vld [vmem:[#allocation2 + $0x158] sm:$0xf] }
 0x17d   :  { %1477 = vpow2.f32 %v1074_v10 }
 0x17e   :  { %v1156_v40 = vrot.slane %v1155_v46, 2  ;;  %v1476_v53 = vpop.eup %1475  ;;  %v905_v9 = vadd.f32 %v904_v57, %v903_v27 }
 0x17f   :  { %v989_v61 = vsel %vm892_vm5, %v1476_v53, 0.0 }
 0x180   :  { %v1157_v18 = vmax.f32 %v1155_v46, %v1156_v40  ;;  %v906_v14 = vrot.slane %v905_v9, 2  ;;  %v990_v5 = vrot.slane %v989_v61, 4 }
 0x182   :  { %v1158_v13 = vrot.slane %v1157_v18, 1  ;;  %v907_v33 = vadd.f32 %v906_v14, %v905_v9  ;;  %v991_v34 = vadd.f32 %v990_v5, %v989_v61 }
 0x184   :  { %v1159_v21 = vmax.f32 %v1157_v18, %v1158_v13  ;;  %v908_v26 = vrot.slane %v907_v33, 1  ;;  %v992_v47 = vrot.slane %v991_v34, 2 }
 0x186   :  { %v1160_v42 = vsub.f32 %v1152_v44, %v1159_v21  ;;  %v909_v11 = vadd.f32 %v908_v26, %v907_v33  ;;  %v993_v1 = vadd.f32 %v992_v47, %v991_v34 }
 0x188   :  { %v1161_v49 = vmul.f32 1.442695, %v1160_v42  ;;  %1479 = vrcp.f32 %v909_v11  ;;  %v994_v43 = vrot.slane %v993_v1, 1 }
 0x18a   :  { %v1478_v55 = vpop.eup %1477  ;;  %1481 = vpow2.f32 %v1161_v49  ;;  %v995_v2 = vadd.f32 %v994_v43, %v993_v1 }
 0x18b   :  { %v1076_v16 = vsel %vm892_vm5, %v1478_v55, 0.0 }
 0x18c   :  { %v1077_v19 = vrot.slane %v1076_v16, 4  ;;  %1483 = vrcp.f32 %v995_v2 }
 0x18e   :  { %v1078_v50 = vadd.f32 %v1077_v19, %v1076_v16 }
 0x190   :  { %v1079_v28 = vrot.slane %v1078_v50, 2 }
 0x192   :  { %v1080_v24 = vadd.f32 %v1079_v28, %v1078_v50 }
 0x194   :  { %v1081_v22 = vrot.slane %v1080_v24, 1 }
 0x195   :  { %v1480_v29 = vpop.eup %1479 }
 0x196   :  { %v1082_v32 = vadd.f32 %v1081_v22, %v1080_v24  ;;  %v911_v8 = vmul.f32 %v1480_v29, %v909_v11 }
 0x197   :  { %v1482_v35 = vpop.eup %1481 }
 0x198   :  { %1485 = vrcp.f32 %v1082_v32  ;;  %v1163_v4 = vsel %vm892_vm5, %v1482_v35, 0.0  ;;  %v912_v17 = vsub.f32 2.0, %v911_v8 }
 0x199   :  { %v1164_v45 = vrot.slane %v1163_v4, 4  ;;  %v1484_v58 = vpop.eup %1483 }
 0x19a   :  { %v913_v25 = vmul.f32 %v1480_v29, %v912_v17  ;;  %v997_v3 = vmul.f32 %v1484_v58, %v995_v2 }
 0x19b   :  { %v1165_v12 = vadd.f32 %v1164_v45, %v1163_v4 }
 0x19c   :  { %v998_v0 = vsub.f32 2.0, %v997_v3  ;;  %v914_v39 = vmul.f32 %v1474_v37, %v913_v25 }
 0x19d   :  { %v1166_v48 = vrot.slane %v1165_v12, 2 }
 0x19e   :  { %v999_v23 = vmul.f32 %v1484_v58, %v998_v0 }
 0x19f   :  { %v1167_v41 = vadd.f32 %v1166_v48, %v1165_v12 }
 0x1a0   :  { %v1000_v52 = vmul.f32 %v1476_v53, %v999_v23 }
 0x1a1   :  { %v1168_v36 = vrot.slane %v1167_v41, 1 }
 0x1a2   :  { %v1001_v15 = vadd.f32 %v1000_v52, %v914_v39 }
 0x1a3   :  { %v1169_v20 = vadd.f32 %v1168_v36, %v1167_v41 }
 0x1a5   :  { %v1486_v54 = vpop.eup %1485  ;;  %1487 = vrcp.f32 %v1169_v20 }
 0x1a6   :  { %v1084_v60 = vmul.f32 %v1486_v54, %v1082_v32 }
 0x1a8   :  { %v1085_v56 = vsub.f32 2.0, %v1084_v60 }
 0x1aa   :  { %v1086_v6 = vmul.f32 %v1486_v54, %v1085_v56 }
 0x1ac   :  { %v1087_v38 = vmul.f32 %v1478_v55, %v1086_v6 }
 0x1ae   :  { %v1088_v63 = vadd.f32 %v1087_v38, %v1001_v15 }
 0x1b2   :  { %v1488_v51 = vpop.eup %1487 }
 0x1b3   :  { %v1171_v7 = vmul.f32 %v1488_v51, %v1169_v20 }
 0x1b5   :  { %v1172_v31 = vsub.f32 2.0, %v1171_v7 }
 0x1b7   :  { %v1173_v44 = vmul.f32 %v1488_v51, %v1172_v31 }
 0x1b9   :  { %v1174_v59 = vmul.f32 %v1482_v35, %v1173_v44 }
 0x1bb   :  { %v1175_v30 = vadd.f32 %v1174_v59, %v1088_v63 }
 0x1bd   :  { %v1177_v37 = vmul.f32 %v1176_v62, %v1175_v30 }
 0x1bf   :  { %v1178_v10 = vsel %vm892_vm5, %v1177_v37, 0.0 }
 0x1c0   :  { %v1179_v27 = vrot.slane %v1178_v10, 4 }
 0x1c2   :  { %v1180_v46 = vadd.f32 %v1179_v27, %v1178_v10 }
 0x1c4   :  { %v1181_v57 = vrot.slane %v1180_v46, 2 }
 0x1c6   :  { %v1182_v40 = vadd.f32 %v1181_v57, %v1180_v46 }
 0x1c8   :  { %v1183_v53 = vrot.slane %v1182_v40, 1 }
 0x1ca   :  { %v1184_v9 = vadd.f32 %v1183_v53, %v1182_v40 }
 0x1cc   :  { %1185 = vst [vmem:[#allocation3] sm:$0x1] %v1184_v9 }
 0x1cd   :  { %1500 = shalt.err (!%p1497_p4)
}
 0x1ce   :  { %1195 = dma.vmem_to_hbm [thread:$0]  %s1193_s29, 16, %s2387_s2, [#allocation4]  }
 0x1cf   :  { %1509 = dma.done.wait [#allocation4], 16  }
 0x1d0   :  { %1510 = vsyncadd [#allocation4], 4294967280 }
 0x1d1   :  { %1199 = vsyncpa [#allocation4], 1 }

</bundles_post_ra>
